<compile_context>
chip_gen: v6e
topology: v6e:2x2x1
jax: 0.10.0
libtpu: 0.0.40
codegen_flags: <defaults>
</compile_context>

<pallas_src>
import functools

import jax
import jax.numpy as jnp
from jax.experimental import pallas as pl
from jax.experimental.pallas import tpu as pltpu

_EPS = 1e-5  # PyTorch BatchNorm2d default eps


def _depthconv_kernel(x_ref, wdw_ref, bdw_ref, w2s_ref, mask_ref, shift_ref,
                      o_ref, *, width, batch, cin):
    # x_ref:     (B*C, HW)    batch*channels on sublanes, flat spatial on lanes
    # wdw_ref:   (9, B*C, 1)  depthwise weights, tiled over the batch rows
    # bdw_ref:   (B*C, 1)     depthwise bias, tiled over the batch rows
    # w2s_ref:   (O, 9*C)     dense 3x3 weights (BN scale folded in), col = k*C + c
    # mask_ref:  (9, 1, HW)   per-tap border mask (reproduces zero padding)
    # shift_ref: (O, 1)       folded BN shift = beta - mean * scale
    # o_ref:     (B, O, HW)   output block (B images)
    HW = x_ref.shape[1]
    O = o_ref.shape[1]
    B, C = batch, cin

    x = x_ref[...]  # (B*C, HW)

    def rolled(a, k):
        # a[:, p + off_k] with circular wraparound; wrapped / out-of-bounds lanes
        # are zeroed by the per-tap masks, reproducing the conv zero padding.
        kh, kw = divmod(k, 3)
        off = (kh - 1) * width + (kw - 1)
        if off == 0:
            return a
        return pltpu.roll(a, (-off) % HW, axis=1)  # XLU lane rotation (free slot)

    # ---- stage 1: depthwise 3x3 (groups=C, pad=1) + bias, sublane-packed batch ----
    y1 = x * wdw_ref[4]                                    # center tap (mask == 1)
    for k in (0, 1, 2, 3, 5, 6, 7, 8):
        y1 = y1 + rolled(x, k) * mask_ref[k] * wdw_ref[k]  # (B*C,HW)*(1,HW)*(B*C,1)
    y1 = y1 + bdw_ref[...]                                 # (B*C,1) lane-broadcast

    # ---- stage 2: dense 3x3 conv C->O (pad=1, no bias, BN scale folded) ----
    acc = [None] * B
    for k in range(9):
        ym = rolled(y1, k)
        if k != 4:
            ym = ym * mask_ref[k]                          # (B*C,HW) * (1,HW)
        for b in range(B):
            for c in range(C):
                col = w2s_ref[:, k * C + c: k * C + c + 1]      # (O, 1)
                term = ym[b * C + c: b * C + c + 1, :] * col    # (1,HW)*(O,1)->(O,HW)
                acc[b] = term if acc[b] is None else acc[b] + term

    # ---- folded BatchNorm shift + ReLU, full-lane stores ----
    shift = shift_ref[...]                                 # (O, 1)
    for b in range(B):
        o_ref[b] = jnp.maximum(acc[b] + shift, 0.0).astype(o_ref.dtype)


def _tap_masks(H, W):
    """(9, H*W) f32: mask[k, h*W + w] == 1 iff 3x3 tap k is in-bounds at (h, w)."""
    hh = jnp.arange(H)[:, None]
    ww = jnp.arange(W)[None, :]
    rows = []
    for kh in range(3):
        for kw in range(3):
            dh, dw = kh - 1, kw - 1
            m = ((hh + dh >= 0) & (hh + dh < H) &
                 (ww + dw >= 0) & (ww + dw < W))
            rows.append(m.reshape(H * W))
    return jnp.stack(rows).astype(jnp.float32)


def _pick_batch_tile(N, C, max_tile=8):
    """Images per grid step. Full batch if small; else a divisor keeping B*C % 8 == 0."""
    if N <= max_tile:
        return N
    for b in range(max_tile, 0, -1):
        if N % b == 0 and (b * C) % 8 == 0:
            return b
    return N


def init_depthconv_params(key, in_channels, out_channels, kernel_per_layer=1):
    assert kernel_per_layer == 1  # matches DepthConv default
    C, O = in_channels, out_channels
    k1, k2, k3 = jax.random.split(key, 3)
    # nn.Conv2d(C, C, 3, groups=C, bias=True): weight (C, 1, 3, 3), bias (C,)
    wdw = jax.random.normal(k1, (C, 1, 3, 3), jnp.float32) * 0.3
    bdw = jax.random.normal(k2, (C,), jnp.float32) * 0.1
    # nn.Conv2d(C, O, 3, bias=False): weight (O, C, 3, 3)
    w2 = jax.random.normal(k3, (O, C, 3, 3), jnp.float32) * 0.2
    # nn.BatchNorm2d(O) defaults: gamma=1, beta=0, running_mean=0, running_var=1
    return dict(
        wdw=wdw, bdw=bdw, w2=w2,
        gamma=jnp.ones((O,), jnp.float32),
        beta=jnp.zeros((O,), jnp.float32),
        running_mean=jnp.zeros((O,), jnp.float32),
        running_var=jnp.ones((O,), jnp.float32),
    )


def prepare_depthconv(params, H, W, batch_tile):
    """One-time weight/mask packing (hoisted out of the per-call forward path)."""
    C = params["wdw"].shape[0]
    O = params["w2"].shape[0]
    B = batch_tile

    mask = _tap_masks(H, W)                                        # (9, HW)

    # depthwise: (C,1,3,3) -> (9, C) -> tiled over batch rows -> (9, B*C, 1)
    wdw = jnp.transpose(params["wdw"].reshape(C, 9), (1, 0))       # (9, C)
    wdw_p = jnp.tile(wdw, (1, B))[..., None].astype(jnp.float32)   # (9, B*C, 1)
    bdw_p = jnp.tile(params["bdw"], (B,))[:, None].astype(jnp.float32)  # (B*C, 1)

    # BN folding
    scale = params["gamma"] / jnp.sqrt(params["running_var"] + _EPS)     # (O,)
    shift = (params["beta"] - params["running_mean"] * scale)[:, None]   # (O, 1)

    # dense conv: (O,C,3,3) -> (O, 9*C) with column index k*C + c, scale folded in
    w2s = jnp.transpose(params["w2"].reshape(O, C, 9), (0, 2, 1)).reshape(O, 9 * C)
    w2s = (w2s * scale[:, None]).astype(jnp.float32)               # (O, 9*C)

    return dict(
        wdw_p=wdw_p, bdw_p=bdw_p, w2s=w2s,
        mask=mask[:, None, :],                                     # (9, 1, HW)
        shift=shift.astype(jnp.float32),
        cin=C, cout=O, batch_tile=B, H=H, W=W,
    )


@jax.jit
def depthconv_forward(x, packed):
    N, C, H, W = x.shape
    HW = H * W
    O = packed["w2s"].shape[0]
    B = packed["wdw_p"].shape[1] // C
    assert N % B == 0, "batch must be a multiple of the prepared batch tile"

    # NCHW -> (N*C, H*W): flat spatial on lanes, batch*channels on sublanes.
    x_flat = x.reshape(N * C, HW).astype(jnp.float32)

    kernel = functools.partial(_depthconv_kernel, width=W, batch=B, cin=C)
    out_flat = pl.pallas_call(
        kernel,
        out_shape=jax.ShapeDtypeStruct((N, O, HW), jnp.float32),
        grid=(N // B,),
        in_specs=[
            pl.BlockSpec((B * C, HW), lambda n: (n, 0)),
            pl.BlockSpec((9, B * C, 1), lambda n: (0, 0, 0)),
            pl.BlockSpec((B * C, 1), lambda n: (0, 0)),
            pl.BlockSpec((O, 9 * C), lambda n: (0, 0)),
            pl.BlockSpec((9, 1, HW), lambda n: (0, 0, 0)),
            pl.BlockSpec((O, 1), lambda n: (0, 0)),
        ],
        out_specs=pl.BlockSpec((B, O, HW), lambda n: (n, 0, 0)),
        compiler_params=pltpu.CompilerParams(dimension_semantics=("parallel",)),
    )(x_flat, packed["wdw_p"], packed["bdw_p"], packed["w2s"],
      packed["mask"], packed["shift"])

    # (N, O, H*W) -> NCHW (pure reshape; no transpose needed with this layout).
    return out_flat.reshape(N, O, H, W)


def depthconv_reference(x, params):
    """Pure-JAX NCHW reference of the same forward pass (for validation)."""
    dn = ("NCHW", "OIHW", "NCHW")
    y1 = jax.lax.conv_general_dilated(
        x, params["wdw"], window_strides=(1, 1), padding=((1, 1), (1, 1)),
        dimension_numbers=dn, feature_group_count=x.shape[1])
    y1 = y1 + params["bdw"][None, :, None, None]
    y2 = jax.lax.conv_general_dilated(
        y1, params["w2"], window_strides=(1, 1), padding=((1, 1), (1, 1)),
        dimension_numbers=dn)
    scale = params["gamma"] / jnp.sqrt(params["running_var"] + _EPS)
    shift = params["beta"] - params["running_mean"] * scale
    return jnp.maximum(y2 * scale[None, :, None, None] + shift[None, :, None, None], 0.0)


if __name__ == "__main__":
    key = jax.random.PRNGKey(0)
    kx, kp = jax.random.split(key)

    N, C_in, C_out, H, W = 2, 4, 8, 16, 16
    x = jax.random.normal(kx, (N, C_in, H, W), jnp.float32)
    params = init_depthconv_params(kp, C_in, C_out)

    # One-time prep (outside the per-call path); B=2 -> single grid step for N=2.
    B = _pick_batch_tile(N, C_in)
    packed = prepare_depthconv(params, H, W, B)

    out = depthconv_forward(x, packed)
    out = jax.block_until_ready(out)
    assert out.shape == (N, C_out, H, W)

    ref = depthconv_reference(x, params)
    err = float(jnp.max(jnp.abs(out - ref)))
    if not bool(jnp.allclose(out, ref, atol=1e-4, rtol=1e-4)):
        raise AssertionError(f"Pallas kernel mismatch vs reference, max err = {err}")

    # TODO(synk): BatchNorm is implemented in inference mode (folded running stats);
    # PyTorch training-mode batch statistics are not reproduced.
    print("KERNEL_OK")
</pallas_src>

<mosaic_0001>
module attributes {stable_mosaic.version = 11 : i64} {
  func.func @_depthconv_kernel(%arg0: i32, %arg1: memref<8x256xf32, #tpu.memory_space<vmem>>, %arg2: memref<9x8x1xf32, #tpu.memory_space<vmem>>, %arg3: memref<8x1xf32, #tpu.memory_space<vmem>>, %arg4: memref<8x36xf32, #tpu.memory_space<vmem>>, %arg5: memref<9x1x256xf32, #tpu.memory_space<vmem>>, %arg6: memref<8x1xf32, #tpu.memory_space<vmem>>, %arg7: memref<2x8x256xf32, #tpu.memory_space<vmem>>) attributes {dimension_semantics = [#tpu.dimension_semantics<parallel>], iteration_bounds = array<i64: 1>, scalar_prefetch = 0 : i64, scratch_operands = 0 : i64, tpu.core_type = #tpu.core_type<tc>, window_params = [{transform_indices = @transform_0, window_bounds = array<i64: 8, 256>}, {pipeline_mode = #tpu.pipeline_mode<synchronous>, transform_indices = @transform_1, window_bounds = array<i64: 9, 8, 1>}, {pipeline_mode = #tpu.pipeline_mode<synchronous>, transform_indices = @transform_2, window_bounds = array<i64: 8, 1>}, {pipeline_mode = #tpu.pipeline_mode<synchronous>, transform_indices = @transform_3, window_bounds = array<i64: 8, 36>}, {pipeline_mode = #tpu.pipeline_mode<synchronous>, transform_indices = @transform_4, window_bounds = array<i64: 9, 1, 256>}, {pipeline_mode = #tpu.pipeline_mode<synchronous>, transform_indices = @transform_5, window_bounds = array<i64: 8, 1>}, {transform_indices = @transform_6, window_bounds = array<i64: 2, 8, 256>}]} {
    %c0 = arith.constant 0 : index
    %c0_0 = arith.constant 0 : index
    %0 = vector.load %arg1[%c0, %c0_0] : memref<8x256xf32, #tpu.memory_space<vmem>>, vector<8x256xf32>
    %c4 = arith.constant 4 : index
    %c0_1 = arith.constant 0 : index
    %c0_2 = arith.constant 0 : index
    %1 = vector.load %arg2[%c4, %c0_1, %c0_2] : memref<9x8x1xf32, #tpu.memory_space<vmem>>, vector<1x8x1xf32>
    %2 = vector.shape_cast %1 : vector<1x8x1xf32> to vector<8x1xf32>
    %3 = vector.broadcast %2 : vector<8x1xf32> to vector<8x256xf32>
    %4 = arith.mulf %0, %3 : vector<8x256xf32>
    %c17_i32 = arith.constant 17 : i32
    %5 = tpu.dynamic_rotate %0 by %c17_i32 dim 1 : vector<8x256xf32>, i32 -> vector<8x256xf32>
    %c0_3 = arith.constant 0 : index
    %c0_4 = arith.constant 0 : index
    %c0_5 = arith.constant 0 : index
    %6 = vector.load %arg5[%c0_3, %c0_4, %c0_5] : memref<9x1x256xf32, #tpu.memory_space<vmem>>, vector<1x1x256xf32>
    %7 = vector.shape_cast %6 : vector<1x1x256xf32> to vector<1x256xf32>
    %8 = vector.broadcast %7 : vector<1x256xf32> to vector<8x256xf32>
    %9 = arith.mulf %5, %8 : vector<8x256xf32>
    %c0_6 = arith.constant 0 : index
    %c0_7 = arith.constant 0 : index
    %c0_8 = arith.constant 0 : index
    %10 = vector.load %arg2[%c0_6, %c0_7, %c0_8] : memref<9x8x1xf32, #tpu.memory_space<vmem>>, vector<1x8x1xf32>
    %11 = vector.shape_cast %10 : vector<1x8x1xf32> to vector<8x1xf32>
    %12 = vector.broadcast %11 : vector<8x1xf32> to vector<8x256xf32>
    %13 = arith.mulf %9, %12 : vector<8x256xf32>
    %14 = arith.addf %4, %13 : vector<8x256xf32>
    %c16_i32 = arith.constant 16 : i32
    %15 = tpu.dynamic_rotate %0 by %c16_i32 dim 1 : vector<8x256xf32>, i32 -> vector<8x256xf32>
    %c1 = arith.constant 1 : index
    %c0_9 = arith.constant 0 : index
    %c0_10 = arith.constant 0 : index
    %16 = vector.load %arg5[%c1, %c0_9, %c0_10] : memref<9x1x256xf32, #tpu.memory_space<vmem>>, vector<1x1x256xf32>
    %17 = vector.shape_cast %16 : vector<1x1x256xf32> to vector<1x256xf32>
    %18 = vector.broadcast %17 : vector<1x256xf32> to vector<8x256xf32>
    %19 = arith.mulf %15, %18 : vector<8x256xf32>
    %c1_11 = arith.constant 1 : index
    %c0_12 = arith.constant 0 : index
    %c0_13 = arith.constant 0 : index
    %20 = vector.load %arg2[%c1_11, %c0_12, %c0_13] : memref<9x8x1xf32, #tpu.memory_space<vmem>>, vector<1x8x1xf32>
    %21 = vector.shape_cast %20 : vector<1x8x1xf32> to vector<8x1xf32>
    %22 = vector.broadcast %21 : vector<8x1xf32> to vector<8x256xf32>
    %23 = arith.mulf %19, %22 : vector<8x256xf32>
    %24 = arith.addf %14, %23 : vector<8x256xf32>
    %c15_i32 = arith.constant 15 : i32
    %25 = tpu.dynamic_rotate %0 by %c15_i32 dim 1 : vector<8x256xf32>, i32 -> vector<8x256xf32>
    %c2 = arith.constant 2 : index
    %c0_14 = arith.constant 0 : index
    %c0_15 = arith.constant 0 : index
    %26 = vector.load %arg5[%c2, %c0_14, %c0_15] : memref<9x1x256xf32, #tpu.memory_space<vmem>>, vector<1x1x256xf32>
    %27 = vector.shape_cast %26 : vector<1x1x256xf32> to vector<1x256xf32>
    %28 = vector.broadcast %27 : vector<1x256xf32> to vector<8x256xf32>
    %29 = arith.mulf %25, %28 : vector<8x256xf32>
    %c2_16 = arith.constant 2 : index
    %c0_17 = arith.constant 0 : index
    %c0_18 = arith.constant 0 : index
    %30 = vector.load %arg2[%c2_16, %c0_17, %c0_18] : memref<9x8x1xf32, #tpu.memory_space<vmem>>, vector<1x8x1xf32>
    %31 = vector.shape_cast %30 : vector<1x8x1xf32> to vector<8x1xf32>
    %32 = vector.broadcast %31 : vector<8x1xf32> to vector<8x256xf32>
    %33 = arith.mulf %29, %32 : vector<8x256xf32>
    %34 = arith.addf %24, %33 : vector<8x256xf32>
    %c1_i32 = arith.constant 1 : i32
    %35 = tpu.dynamic_rotate %0 by %c1_i32 dim 1 : vector<8x256xf32>, i32 -> vector<8x256xf32>
    %c3 = arith.constant 3 : index
    %c0_19 = arith.constant 0 : index
    %c0_20 = arith.constant 0 : index
    %36 = vector.load %arg5[%c3, %c0_19, %c0_20] : memref<9x1x256xf32, #tpu.memory_space<vmem>>, vector<1x1x256xf32>
    %37 = vector.shape_cast %36 : vector<1x1x256xf32> to vector<1x256xf32>
    %38 = vector.broadcast %37 : vector<1x256xf32> to vector<8x256xf32>
    %39 = arith.mulf %35, %38 : vector<8x256xf32>
    %c3_21 = arith.constant 3 : index
    %c0_22 = arith.constant 0 : index
    %c0_23 = arith.constant 0 : index
    %40 = vector.load %arg2[%c3_21, %c0_22, %c0_23] : memref<9x8x1xf32, #tpu.memory_space<vmem>>, vector<1x8x1xf32>
    %41 = vector.shape_cast %40 : vector<1x8x1xf32> to vector<8x1xf32>
    %42 = vector.broadcast %41 : vector<8x1xf32> to vector<8x256xf32>
    %43 = arith.mulf %39, %42 : vector<8x256xf32>
    %44 = arith.addf %34, %43 : vector<8x256xf32>
    %c255_i32 = arith.constant 255 : i32
    %45 = tpu.dynamic_rotate %0 by %c255_i32 dim 1 : vector<8x256xf32>, i32 -> vector<8x256xf32>
    %c5 = arith.constant 5 : index
    %c0_24 = arith.constant 0 : index
    %c0_25 = arith.constant 0 : index
    %46 = vector.load %arg5[%c5, %c0_24, %c0_25] : memref<9x1x256xf32, #tpu.memory_space<vmem>>, vector<1x1x256xf32>
    %47 = vector.shape_cast %46 : vector<1x1x256xf32> to vector<1x256xf32>
    %48 = vector.broadcast %47 : vector<1x256xf32> to vector<8x256xf32>
    %49 = arith.mulf %45, %48 : vector<8x256xf32>
    %c5_26 = arith.constant 5 : index
    %c0_27 = arith.constant 0 : index
    %c0_28 = arith.constant 0 : index
    %50 = vector.load %arg2[%c5_26, %c0_27, %c0_28] : memref<9x8x1xf32, #tpu.memory_space<vmem>>, vector<1x8x1xf32>
    %51 = vector.shape_cast %50 : vector<1x8x1xf32> to vector<8x1xf32>
    %52 = vector.broadcast %51 : vector<8x1xf32> to vector<8x256xf32>
    %53 = arith.mulf %49, %52 : vector<8x256xf32>
    %54 = arith.addf %44, %53 : vector<8x256xf32>
    %c241_i32 = arith.constant 241 : i32
    %55 = tpu.dynamic_rotate %0 by %c241_i32 dim 1 : vector<8x256xf32>, i32 -> vector<8x256xf32>
    %c6 = arith.constant 6 : index
    %c0_29 = arith.constant 0 : index
    %c0_30 = arith.constant 0 : index
    %56 = vector.load %arg5[%c6, %c0_29, %c0_30] : memref<9x1x256xf32, #tpu.memory_space<vmem>>, vector<1x1x256xf32>
    %57 = vector.shape_cast %56 : vector<1x1x256xf32> to vector<1x256xf32>
    %58 = vector.broadcast %57 : vector<1x256xf32> to vector<8x256xf32>
    %59 = arith.mulf %55, %58 : vector<8x256xf32>
    %c6_31 = arith.constant 6 : index
    %c0_32 = arith.constant 0 : index
    %c0_33 = arith.constant 0 : index
    %60 = vector.load %arg2[%c6_31, %c0_32, %c0_33] : memref<9x8x1xf32, #tpu.memory_space<vmem>>, vector<1x8x1xf32>
    %61 = vector.shape_cast %60 : vector<1x8x1xf32> to vector<8x1xf32>
    %62 = vector.broadcast %61 : vector<8x1xf32> to vector<8x256xf32>
    %63 = arith.mulf %59, %62 : vector<8x256xf32>
    %64 = arith.addf %54, %63 : vector<8x256xf32>
    %c240_i32 = arith.constant 240 : i32
    %65 = tpu.dynamic_rotate %0 by %c240_i32 dim 1 : vector<8x256xf32>, i32 -> vector<8x256xf32>
    %c7 = arith.constant 7 : index
    %c0_34 = arith.constant 0 : index
    %c0_35 = arith.constant 0 : index
    %66 = vector.load %arg5[%c7, %c0_34, %c0_35] : memref<9x1x256xf32, #tpu.memory_space<vmem>>, vector<1x1x256xf32>
    %67 = vector.shape_cast %66 : vector<1x1x256xf32> to vector<1x256xf32>
    %68 = vector.broadcast %67 : vector<1x256xf32> to vector<8x256xf32>
    %69 = arith.mulf %65, %68 : vector<8x256xf32>
    %c7_36 = arith.constant 7 : index
    %c0_37 = arith.constant 0 : index
    %c0_38 = arith.constant 0 : index
    %70 = vector.load %arg2[%c7_36, %c0_37, %c0_38] : memref<9x8x1xf32, #tpu.memory_space<vmem>>, vector<1x8x1xf32>
    %71 = vector.shape_cast %70 : vector<1x8x1xf32> to vector<8x1xf32>
    %72 = vector.broadcast %71 : vector<8x1xf32> to vector<8x256xf32>
    %73 = arith.mulf %69, %72 : vector<8x256xf32>
    %74 = arith.addf %64, %73 : vector<8x256xf32>
    %c239_i32 = arith.constant 239 : i32
    %75 = tpu.dynamic_rotate %0 by %c239_i32 dim 1 : vector<8x256xf32>, i32 -> vector<8x256xf32>
    %c8 = arith.constant 8 : index
    %c0_39 = arith.constant 0 : index
    %c0_40 = arith.constant 0 : index
    %76 = vector.load %arg5[%c8, %c0_39, %c0_40] : memref<9x1x256xf32, #tpu.memory_space<vmem>>, vector<1x1x256xf32>
    %77 = vector.shape_cast %76 : vector<1x1x256xf32> to vector<1x256xf32>
    %78 = vector.broadcast %77 : vector<1x256xf32> to vector<8x256xf32>
    %79 = arith.mulf %75, %78 : vector<8x256xf32>
    %c8_41 = arith.constant 8 : index
    %c0_42 = arith.constant 0 : index
    %c0_43 = arith.constant 0 : index
    %80 = vector.load %arg2[%c8_41, %c0_42, %c0_43] : memref<9x8x1xf32, #tpu.memory_space<vmem>>, vector<1x8x1xf32>
    %81 = vector.shape_cast %80 : vector<1x8x1xf32> to vector<8x1xf32>
    %82 = vector.broadcast %81 : vector<8x1xf32> to vector<8x256xf32>
    %83 = arith.mulf %79, %82 : vector<8x256xf32>
    %84 = arith.addf %74, %83 : vector<8x256xf32>
    %c0_44 = arith.constant 0 : index
    %c0_45 = arith.constant 0 : index
    %85 = vector.load %arg3[%c0_44, %c0_45] : memref<8x1xf32, #tpu.memory_space<vmem>>, vector<8x1xf32>
    %86 = vector.broadcast %85 : vector<8x1xf32> to vector<8x256xf32>
    %87 = arith.addf %84, %86 : vector<8x256xf32>
    %c17_i32_46 = arith.constant 17 : i32
    %88 = tpu.dynamic_rotate %87 by %c17_i32_46 dim 1 : vector<8x256xf32>, i32 -> vector<8x256xf32>
    %c0_47 = arith.constant 0 : index
    %c0_48 = arith.constant 0 : index
    %c0_49 = arith.constant 0 : index
    %89 = vector.load %arg5[%c0_47, %c0_48, %c0_49] : memref<9x1x256xf32, #tpu.memory_space<vmem>>, vector<1x1x256xf32>
    %90 = vector.shape_cast %89 : vector<1x1x256xf32> to vector<1x256xf32>
    %91 = vector.broadcast %90 : vector<1x256xf32> to vector<8x256xf32>
    %92 = arith.mulf %88, %91 : vector<8x256xf32>
    %c0_50 = arith.constant 0 : index
    %c0_51 = arith.constant 0 : index
    %93 = vector.load %arg4[%c0_50, %c0_51] : memref<8x36xf32, #tpu.memory_space<vmem>>, vector<8x1xf32>
    %94 = vector.extract_strided_slice %92 {offsets = [0, 0], sizes = [1, 256], strides = [1, 1]} : vector<8x256xf32> to vector<1x256xf32>
    %95 = vector.broadcast %94 : vector<1x256xf32> to vector<8x256xf32>
    %96 = vector.broadcast %93 : vector<8x1xf32> to vector<8x256xf32>
    %97 = arith.mulf %95, %96 : vector<8x256xf32>
    %c0_52 = arith.constant 0 : index
    %c1_53 = arith.constant 1 : index
    %98 = vector.load %arg4[%c0_52, %c1_53] : memref<8x36xf32, #tpu.memory_space<vmem>>, vector<8x1xf32>
    %99 = vector.extract_strided_slice %92 {offsets = [1, 0], sizes = [1, 256], strides = [1, 1]} : vector<8x256xf32> to vector<1x256xf32>
    %100 = vector.broadcast %99 : vector<1x256xf32> to vector<8x256xf32>
    %101 = vector.broadcast %98 : vector<8x1xf32> to vector<8x256xf32>
    %102 = arith.mulf %100, %101 : vector<8x256xf32>
    %103 = arith.addf %97, %102 : vector<8x256xf32>
    %c0_54 = arith.constant 0 : index
    %c2_55 = arith.constant 2 : index
    %104 = vector.load %arg4[%c0_54, %c2_55] : memref<8x36xf32, #tpu.memory_space<vmem>>, vector<8x1xf32>
    %105 = vector.extract_strided_slice %92 {offsets = [2, 0], sizes = [1, 256], strides = [1, 1]} : vector<8x256xf32> to vector<1x256xf32>
    %106 = vector.broadcast %105 : vector<1x256xf32> to vector<8x256xf32>
    %107 = vector.broadcast %104 : vector<8x1xf32> to vector<8x256xf32>
    %108 = arith.mulf %106, %107 : vector<8x256xf32>
    %109 = arith.addf %103, %108 : vector<8x256xf32>
    %c0_56 = arith.constant 0 : index
    %c3_57 = arith.constant 3 : index
    %110 = vector.load %arg4[%c0_56, %c3_57] : memref<8x36xf32, #tpu.memory_space<vmem>>, vector<8x1xf32>
    %111 = vector.extract_strided_slice %92 {offsets = [3, 0], sizes = [1, 256], strides = [1, 1]} : vector<8x256xf32> to vector<1x256xf32>
    %112 = vector.broadcast %111 : vector<1x256xf32> to vector<8x256xf32>
    %113 = vector.broadcast %110 : vector<8x1xf32> to vector<8x256xf32>
    %114 = arith.mulf %112, %113 : vector<8x256xf32>
    %115 = arith.addf %109, %114 : vector<8x256xf32>
    %c0_58 = arith.constant 0 : index
    %c0_59 = arith.constant 0 : index
    %116 = vector.load %arg4[%c0_58, %c0_59] : memref<8x36xf32, #tpu.memory_space<vmem>>, vector<8x1xf32>
    %117 = vector.extract_strided_slice %92 {offsets = [4, 0], sizes = [1, 256], strides = [1, 1]} : vector<8x256xf32> to vector<1x256xf32>
    %118 = vector.broadcast %117 : vector<1x256xf32> to vector<8x256xf32>
    %119 = vector.broadcast %116 : vector<8x1xf32> to vector<8x256xf32>
    %120 = arith.mulf %118, %119 : vector<8x256xf32>
    %c0_60 = arith.constant 0 : index
    %c1_61 = arith.constant 1 : index
    %121 = vector.load %arg4[%c0_60, %c1_61] : memref<8x36xf32, #tpu.memory_space<vmem>>, vector<8x1xf32>
    %122 = vector.extract_strided_slice %92 {offsets = [5, 0], sizes = [1, 256], strides = [1, 1]} : vector<8x256xf32> to vector<1x256xf32>
    %123 = vector.broadcast %122 : vector<1x256xf32> to vector<8x256xf32>
    %124 = vector.broadcast %121 : vector<8x1xf32> to vector<8x256xf32>
    %125 = arith.mulf %123, %124 : vector<8x256xf32>
    %126 = arith.addf %120, %125 : vector<8x256xf32>
    %c0_62 = arith.constant 0 : index
    %c2_63 = arith.constant 2 : index
    %127 = vector.load %arg4[%c0_62, %c2_63] : memref<8x36xf32, #tpu.memory_space<vmem>>, vector<8x1xf32>
    %128 = vector.extract_strided_slice %92 {offsets = [6, 0], sizes = [1, 256], strides = [1, 1]} : vector<8x256xf32> to vector<1x256xf32>
    %129 = vector.broadcast %128 : vector<1x256xf32> to vector<8x256xf32>
    %130 = vector.broadcast %127 : vector<8x1xf32> to vector<8x256xf32>
    %131 = arith.mulf %129, %130 : vector<8x256xf32>
    %132 = arith.addf %126, %131 : vector<8x256xf32>
    %c0_64 = arith.constant 0 : index
    %c3_65 = arith.constant 3 : index
    %133 = vector.load %arg4[%c0_64, %c3_65] : memref<8x36xf32, #tpu.memory_space<vmem>>, vector<8x1xf32>
    %134 = vector.extract_strided_slice %92 {offsets = [7, 0], sizes = [1, 256], strides = [1, 1]} : vector<8x256xf32> to vector<1x256xf32>
    %135 = vector.broadcast %134 : vector<1x256xf32> to vector<8x256xf32>
    %136 = vector.broadcast %133 : vector<8x1xf32> to vector<8x256xf32>
    %137 = arith.mulf %135, %136 : vector<8x256xf32>
    %138 = arith.addf %132, %137 : vector<8x256xf32>
    %c16_i32_66 = arith.constant 16 : i32
    %139 = tpu.dynamic_rotate %87 by %c16_i32_66 dim 1 : vector<8x256xf32>, i32 -> vector<8x256xf32>
    %c1_67 = arith.constant 1 : index
    %c0_68 = arith.constant 0 : index
    %c0_69 = arith.constant 0 : index
    %140 = vector.load %arg5[%c1_67, %c0_68, %c0_69] : memref<9x1x256xf32, #tpu.memory_space<vmem>>, vector<1x1x256xf32>
    %141 = vector.shape_cast %140 : vector<1x1x256xf32> to vector<1x256xf32>
    %142 = vector.broadcast %141 : vector<1x256xf32> to vector<8x256xf32>
    %143 = arith.mulf %139, %142 : vector<8x256xf32>
    %c0_70 = arith.constant 0 : index
    %c4_71 = arith.constant 4 : index
    %144 = vector.load %arg4[%c0_70, %c4_71] : memref<8x36xf32, #tpu.memory_space<vmem>>, vector<8x1xf32>
    %145 = vector.extract_strided_slice %143 {offsets = [0, 0], sizes = [1, 256], strides = [1, 1]} : vector<8x256xf32> to vector<1x256xf32>
    %146 = vector.broadcast %145 : vector<1x256xf32> to vector<8x256xf32>
    %147 = vector.broadcast %144 : vector<8x1xf32> to vector<8x256xf32>
    %148 = arith.mulf %146, %147 : vector<8x256xf32>
    %149 = arith.addf %115, %148 : vector<8x256xf32>
    %c0_72 = arith.constant 0 : index
    %c5_73 = arith.constant 5 : index
    %150 = vector.load %arg4[%c0_72, %c5_73] : memref<8x36xf32, #tpu.memory_space<vmem>>, vector<8x1xf32>
    %151 = vector.extract_strided_slice %143 {offsets = [1, 0], sizes = [1, 256], strides = [1, 1]} : vector<8x256xf32> to vector<1x256xf32>
    %152 = vector.broadcast %151 : vector<1x256xf32> to vector<8x256xf32>
    %153 = vector.broadcast %150 : vector<8x1xf32> to vector<8x256xf32>
    %154 = arith.mulf %152, %153 : vector<8x256xf32>
    %155 = arith.addf %149, %154 : vector<8x256xf32>
    %c0_74 = arith.constant 0 : index
    %c6_75 = arith.constant 6 : index
    %156 = vector.load %arg4[%c0_74, %c6_75] : memref<8x36xf32, #tpu.memory_space<vmem>>, vector<8x1xf32>
    %157 = vector.extract_strided_slice %143 {offsets = [2, 0], sizes = [1, 256], strides = [1, 1]} : vector<8x256xf32> to vector<1x256xf32>
    %158 = vector.broadcast %157 : vector<1x256xf32> to vector<8x256xf32>
    %159 = vector.broadcast %156 : vector<8x1xf32> to vector<8x256xf32>
    %160 = arith.mulf %158, %159 : vector<8x256xf32>
    %161 = arith.addf %155, %160 : vector<8x256xf32>
    %c0_76 = arith.constant 0 : index
    %c7_77 = arith.constant 7 : index
    %162 = vector.load %arg4[%c0_76, %c7_77] : memref<8x36xf32, #tpu.memory_space<vmem>>, vector<8x1xf32>
    %163 = vector.extract_strided_slice %143 {offsets = [3, 0], sizes = [1, 256], strides = [1, 1]} : vector<8x256xf32> to vector<1x256xf32>
    %164 = vector.broadcast %163 : vector<1x256xf32> to vector<8x256xf32>
    %165 = vector.broadcast %162 : vector<8x1xf32> to vector<8x256xf32>
    %166 = arith.mulf %164, %165 : vector<8x256xf32>
    %167 = arith.addf %161, %166 : vector<8x256xf32>
    %c0_78 = arith.constant 0 : index
    %c4_79 = arith.constant 4 : index
    %168 = vector.load %arg4[%c0_78, %c4_79] : memref<8x36xf32, #tpu.memory_space<vmem>>, vector<8x1xf32>
    %169 = vector.extract_strided_slice %143 {offsets = [4, 0], sizes = [1, 256], strides = [1, 1]} : vector<8x256xf32> to vector<1x256xf32>
    %170 = vector.broadcast %169 : vector<1x256xf32> to vector<8x256xf32>
    %171 = vector.broadcast %168 : vector<8x1xf32> to vector<8x256xf32>
    %172 = arith.mulf %170, %171 : vector<8x256xf32>
    %173 = arith.addf %138, %172 : vector<8x256xf32>
    %c0_80 = arith.constant 0 : index
    %c5_81 = arith.constant 5 : index
    %174 = vector.load %arg4[%c0_80, %c5_81] : memref<8x36xf32, #tpu.memory_space<vmem>>, vector<8x1xf32>
    %175 = vector.extract_strided_slice %143 {offsets = [5, 0], sizes = [1, 256], strides = [1, 1]} : vector<8x256xf32> to vector<1x256xf32>
    %176 = vector.broadcast %175 : vector<1x256xf32> to vector<8x256xf32>
    %177 = vector.broadcast %174 : vector<8x1xf32> to vector<8x256xf32>
    %178 = arith.mulf %176, %177 : vector<8x256xf32>
    %179 = arith.addf %173, %178 : vector<8x256xf32>
    %c0_82 = arith.constant 0 : index
    %c6_83 = arith.constant 6 : index
    %180 = vector.load %arg4[%c0_82, %c6_83] : memref<8x36xf32, #tpu.memory_space<vmem>>, vector<8x1xf32>
    %181 = vector.extract_strided_slice %143 {offsets = [6, 0], sizes = [1, 256], strides = [1, 1]} : vector<8x256xf32> to vector<1x256xf32>
    %182 = vector.broadcast %181 : vector<1x256xf32> to vector<8x256xf32>
    %183 = vector.broadcast %180 : vector<8x1xf32> to vector<8x256xf32>
    %184 = arith.mulf %182, %183 : vector<8x256xf32>
    %185 = arith.addf %179, %184 : vector<8x256xf32>
    %c0_84 = arith.constant 0 : index
    %c7_85 = arith.constant 7 : index
    %186 = vector.load %arg4[%c0_84, %c7_85] : memref<8x36xf32, #tpu.memory_space<vmem>>, vector<8x1xf32>
    %187 = vector.extract_strided_slice %143 {offsets = [7, 0], sizes = [1, 256], strides = [1, 1]} : vector<8x256xf32> to vector<1x256xf32>
    %188 = vector.broadcast %187 : vector<1x256xf32> to vector<8x256xf32>
    %189 = vector.broadcast %186 : vector<8x1xf32> to vector<8x256xf32>
    %190 = arith.mulf %188, %189 : vector<8x256xf32>
    %191 = arith.addf %185, %190 : vector<8x256xf32>
    %c15_i32_86 = arith.constant 15 : i32
    %192 = tpu.dynamic_rotate %87 by %c15_i32_86 dim 1 : vector<8x256xf32>, i32 -> vector<8x256xf32>
    %c2_87 = arith.constant 2 : index
    %c0_88 = arith.constant 0 : index
    %c0_89 = arith.constant 0 : index
    %193 = vector.load %arg5[%c2_87, %c0_88, %c0_89] : memref<9x1x256xf32, #tpu.memory_space<vmem>>, vector<1x1x256xf32>
    %194 = vector.shape_cast %193 : vector<1x1x256xf32> to vector<1x256xf32>
    %195 = vector.broadcast %194 : vector<1x256xf32> to vector<8x256xf32>
    %196 = arith.mulf %192, %195 : vector<8x256xf32>
    %c0_90 = arith.constant 0 : index
    %c8_91 = arith.constant 8 : index
    %197 = vector.load %arg4[%c0_90, %c8_91] : memref<8x36xf32, #tpu.memory_space<vmem>>, vector<8x1xf32>
    %198 = vector.extract_strided_slice %196 {offsets = [0, 0], sizes = [1, 256], strides = [1, 1]} : vector<8x256xf32> to vector<1x256xf32>
    %199 = vector.broadcast %198 : vector<1x256xf32> to vector<8x256xf32>
    %200 = vector.broadcast %197 : vector<8x1xf32> to vector<8x256xf32>
    %201 = arith.mulf %199, %200 : vector<8x256xf32>
    %202 = arith.addf %167, %201 : vector<8x256xf32>
    %c0_92 = arith.constant 0 : index
    %c9 = arith.constant 9 : index
    %203 = vector.load %arg4[%c0_92, %c9] : memref<8x36xf32, #tpu.memory_space<vmem>>, vector<8x1xf32>
    %204 = vector.extract_strided_slice %196 {offsets = [1, 0], sizes = [1, 256], strides = [1, 1]} : vector<8x256xf32> to vector<1x256xf32>
    %205 = vector.broadcast %204 : vector<1x256xf32> to vector<8x256xf32>
    %206 = vector.broadcast %203 : vector<8x1xf32> to vector<8x256xf32>
    %207 = arith.mulf %205, %206 : vector<8x256xf32>
    %208 = arith.addf %202, %207 : vector<8x256xf32>
    %c0_93 = arith.constant 0 : index
    %c10 = arith.constant 10 : index
    %209 = vector.load %arg4[%c0_93, %c10] : memref<8x36xf32, #tpu.memory_space<vmem>>, vector<8x1xf32>
    %210 = vector.extract_strided_slice %196 {offsets = [2, 0], sizes = [1, 256], strides = [1, 1]} : vector<8x256xf32> to vector<1x256xf32>
    %211 = vector.broadcast %210 : vector<1x256xf32> to vector<8x256xf32>
    %212 = vector.broadcast %209 : vector<8x1xf32> to vector<8x256xf32>
    %213 = arith.mulf %211, %212 : vector<8x256xf32>
    %214 = arith.addf %208, %213 : vector<8x256xf32>
    %c0_94 = arith.constant 0 : index
    %c11 = arith.constant 11 : index
    %215 = vector.load %arg4[%c0_94, %c11] : memref<8x36xf32, #tpu.memory_space<vmem>>, vector<8x1xf32>
    %216 = vector.extract_strided_slice %196 {offsets = [3, 0], sizes = [1, 256], strides = [1, 1]} : vector<8x256xf32> to vector<1x256xf32>
    %217 = vector.broadcast %216 : vector<1x256xf32> to vector<8x256xf32>
    %218 = vector.broadcast %215 : vector<8x1xf32> to vector<8x256xf32>
    %219 = arith.mulf %217, %218 : vector<8x256xf32>
    %220 = arith.addf %214, %219 : vector<8x256xf32>
    %c0_95 = arith.constant 0 : index
    %c8_96 = arith.constant 8 : index
    %221 = vector.load %arg4[%c0_95, %c8_96] : memref<8x36xf32, #tpu.memory_space<vmem>>, vector<8x1xf32>
    %222 = vector.extract_strided_slice %196 {offsets = [4, 0], sizes = [1, 256], strides = [1, 1]} : vector<8x256xf32> to vector<1x256xf32>
    %223 = vector.broadcast %222 : vector<1x256xf32> to vector<8x256xf32>
    %224 = vector.broadcast %221 : vector<8x1xf32> to vector<8x256xf32>
    %225 = arith.mulf %223, %224 : vector<8x256xf32>
    %226 = arith.addf %191, %225 : vector<8x256xf32>
    %c0_97 = arith.constant 0 : index
    %c9_98 = arith.constant 9 : index
    %227 = vector.load %arg4[%c0_97, %c9_98] : memref<8x36xf32, #tpu.memory_space<vmem>>, vector<8x1xf32>
    %228 = vector.extract_strided_slice %196 {offsets = [5, 0], sizes = [1, 256], strides = [1, 1]} : vector<8x256xf32> to vector<1x256xf32>
    %229 = vector.broadcast %228 : vector<1x256xf32> to vector<8x256xf32>
    %230 = vector.broadcast %227 : vector<8x1xf32> to vector<8x256xf32>
    %231 = arith.mulf %229, %230 : vector<8x256xf32>
    %232 = arith.addf %226, %231 : vector<8x256xf32>
    %c0_99 = arith.constant 0 : index
    %c10_100 = arith.constant 10 : index
    %233 = vector.load %arg4[%c0_99, %c10_100] : memref<8x36xf32, #tpu.memory_space<vmem>>, vector<8x1xf32>
    %234 = vector.extract_strided_slice %196 {offsets = [6, 0], sizes = [1, 256], strides = [1, 1]} : vector<8x256xf32> to vector<1x256xf32>
    %235 = vector.broadcast %234 : vector<1x256xf32> to vector<8x256xf32>
    %236 = vector.broadcast %233 : vector<8x1xf32> to vector<8x256xf32>
    %237 = arith.mulf %235, %236 : vector<8x256xf32>
    %238 = arith.addf %232, %237 : vector<8x256xf32>
    %c0_101 = arith.constant 0 : index
    %c11_102 = arith.constant 11 : index
    %239 = vector.load %arg4[%c0_101, %c11_102] : memref<8x36xf32, #tpu.memory_space<vmem>>, vector<8x1xf32>
    %240 = vector.extract_strided_slice %196 {offsets = [7, 0], sizes = [1, 256], strides = [1, 1]} : vector<8x256xf32> to vector<1x256xf32>
    %241 = vector.broadcast %240 : vector<1x256xf32> to vector<8x256xf32>
    %242 = vector.broadcast %239 : vector<8x1xf32> to vector<8x256xf32>
    %243 = arith.mulf %241, %242 : vector<8x256xf32>
    %244 = arith.addf %238, %243 : vector<8x256xf32>
    %c1_i32_103 = arith.constant 1 : i32
    %245 = tpu.dynamic_rotate %87 by %c1_i32_103 dim 1 : vector<8x256xf32>, i32 -> vector<8x256xf32>
    %c3_104 = arith.constant 3 : index
    %c0_105 = arith.constant 0 : index
    %c0_106 = arith.constant 0 : index
    %246 = vector.load %arg5[%c3_104, %c0_105, %c0_106] : memref<9x1x256xf32, #tpu.memory_space<vmem>>, vector<1x1x256xf32>
    %247 = vector.shape_cast %246 : vector<1x1x256xf32> to vector<1x256xf32>
    %248 = vector.broadcast %247 : vector<1x256xf32> to vector<8x256xf32>
    %249 = arith.mulf %245, %248 : vector<8x256xf32>
    %c0_107 = arith.constant 0 : index
    %c12 = arith.constant 12 : index
    %250 = vector.load %arg4[%c0_107, %c12] : memref<8x36xf32, #tpu.memory_space<vmem>>, vector<8x1xf32>
    %251 = vector.extract_strided_slice %249 {offsets = [0, 0], sizes = [1, 256], strides = [1, 1]} : vector<8x256xf32> to vector<1x256xf32>
    %252 = vector.broadcast %251 : vector<1x256xf32> to vector<8x256xf32>
    %253 = vector.broadcast %250 : vector<8x1xf32> to vector<8x256xf32>
    %254 = arith.mulf %252, %253 : vector<8x256xf32>
    %255 = arith.addf %220, %254 : vector<8x256xf32>
    %c0_108 = arith.constant 0 : index
    %c13 = arith.constant 13 : index
    %256 = vector.load %arg4[%c0_108, %c13] : memref<8x36xf32, #tpu.memory_space<vmem>>, vector<8x1xf32>
    %257 = vector.extract_strided_slice %249 {offsets = [1, 0], sizes = [1, 256], strides = [1, 1]} : vector<8x256xf32> to vector<1x256xf32>
    %258 = vector.broadcast %257 : vector<1x256xf32> to vector<8x256xf32>
    %259 = vector.broadcast %256 : vector<8x1xf32> to vector<8x256xf32>
    %260 = arith.mulf %258, %259 : vector<8x256xf32>
    %261 = arith.addf %255, %260 : vector<8x256xf32>
    %c0_109 = arith.constant 0 : index
    %c14 = arith.constant 14 : index
    %262 = vector.load %arg4[%c0_109, %c14] : memref<8x36xf32, #tpu.memory_space<vmem>>, vector<8x1xf32>
    %263 = vector.extract_strided_slice %249 {offsets = [2, 0], sizes = [1, 256], strides = [1, 1]} : vector<8x256xf32> to vector<1x256xf32>
    %264 = vector.broadcast %263 : vector<1x256xf32> to vector<8x256xf32>
    %265 = vector.broadcast %262 : vector<8x1xf32> to vector<8x256xf32>
    %266 = arith.mulf %264, %265 : vector<8x256xf32>
    %267 = arith.addf %261, %266 : vector<8x256xf32>
    %c0_110 = arith.constant 0 : index
    %c15 = arith.constant 15 : index
    %268 = vector.load %arg4[%c0_110, %c15] : memref<8x36xf32, #tpu.memory_space<vmem>>, vector<8x1xf32>
    %269 = vector.extract_strided_slice %249 {offsets = [3, 0], sizes = [1, 256], strides = [1, 1]} : vector<8x256xf32> to vector<1x256xf32>
    %270 = vector.broadcast %269 : vector<1x256xf32> to vector<8x256xf32>
    %271 = vector.broadcast %268 : vector<8x1xf32> to vector<8x256xf32>
    %272 = arith.mulf %270, %271 : vector<8x256xf32>
    %273 = arith.addf %267, %272 : vector<8x256xf32>
    %c0_111 = arith.constant 0 : index
    %c12_112 = arith.constant 12 : index
    %274 = vector.load %arg4[%c0_111, %c12_112] : memref<8x36xf32, #tpu.memory_space<vmem>>, vector<8x1xf32>
    %275 = vector.extract_strided_slice %249 {offsets = [4, 0], sizes = [1, 256], strides = [1, 1]} : vector<8x256xf32> to vector<1x256xf32>
    %276 = vector.broadcast %275 : vector<1x256xf32> to vector<8x256xf32>
    %277 = vector.broadcast %274 : vector<8x1xf32> to vector<8x256xf32>
    %278 = arith.mulf %276, %277 : vector<8x256xf32>
    %279 = arith.addf %244, %278 : vector<8x256xf32>
    %c0_113 = arith.constant 0 : index
    %c13_114 = arith.constant 13 : index
    %280 = vector.load %arg4[%c0_113, %c13_114] : memref<8x36xf32, #tpu.memory_space<vmem>>, vector<8x1xf32>
    %281 = vector.extract_strided_slice %249 {offsets = [5, 0], sizes = [1, 256], strides = [1, 1]} : vector<8x256xf32> to vector<1x256xf32>
    %282 = vector.broadcast %281 : vector<1x256xf32> to vector<8x256xf32>
    %283 = vector.broadcast %280 : vector<8x1xf32> to vector<8x256xf32>
    %284 = arith.mulf %282, %283 : vector<8x256xf32>
    %285 = arith.addf %279, %284 : vector<8x256xf32>
    %c0_115 = arith.constant 0 : index
    %c14_116 = arith.constant 14 : index
    %286 = vector.load %arg4[%c0_115, %c14_116] : memref<8x36xf32, #tpu.memory_space<vmem>>, vector<8x1xf32>
    %287 = vector.extract_strided_slice %249 {offsets = [6, 0], sizes = [1, 256], strides = [1, 1]} : vector<8x256xf32> to vector<1x256xf32>
    %288 = vector.broadcast %287 : vector<1x256xf32> to vector<8x256xf32>
    %289 = vector.broadcast %286 : vector<8x1xf32> to vector<8x256xf32>
    %290 = arith.mulf %288, %289 : vector<8x256xf32>
    %291 = arith.addf %285, %290 : vector<8x256xf32>
    %c0_117 = arith.constant 0 : index
    %c15_118 = arith.constant 15 : index
    %292 = vector.load %arg4[%c0_117, %c15_118] : memref<8x36xf32, #tpu.memory_space<vmem>>, vector<8x1xf32>
    %293 = vector.extract_strided_slice %249 {offsets = [7, 0], sizes = [1, 256], strides = [1, 1]} : vector<8x256xf32> to vector<1x256xf32>
    %294 = vector.broadcast %293 : vector<1x256xf32> to vector<8x256xf32>
    %295 = vector.broadcast %292 : vector<8x1xf32> to vector<8x256xf32>
    %296 = arith.mulf %294, %295 : vector<8x256xf32>
    %297 = arith.addf %291, %296 : vector<8x256xf32>
    %c0_119 = arith.constant 0 : index
    %c16 = arith.constant 16 : index
    %298 = vector.load %arg4[%c0_119, %c16] : memref<8x36xf32, #tpu.memory_space<vmem>>, vector<8x1xf32>
    %299 = vector.extract_strided_slice %87 {offsets = [0, 0], sizes = [1, 256], strides = [1, 1]} : vector<8x256xf32> to vector<1x256xf32>
    %300 = vector.broadcast %299 : vector<1x256xf32> to vector<8x256xf32>
    %301 = vector.broadcast %298 : vector<8x1xf32> to vector<8x256xf32>
    %302 = arith.mulf %300, %301 : vector<8x256xf32>
    %303 = arith.addf %273, %302 : vector<8x256xf32>
    %c0_120 = arith.constant 0 : index
    %c17 = arith.constant 17 : index
    %304 = vector.load %arg4[%c0_120, %c17] : memref<8x36xf32, #tpu.memory_space<vmem>>, vector<8x1xf32>
    %305 = vector.extract_strided_slice %87 {offsets = [1, 0], sizes = [1, 256], strides = [1, 1]} : vector<8x256xf32> to vector<1x256xf32>
    %306 = vector.broadcast %305 : vector<1x256xf32> to vector<8x256xf32>
    %307 = vector.broadcast %304 : vector<8x1xf32> to vector<8x256xf32>
    %308 = arith.mulf %306, %307 : vector<8x256xf32>
    %309 = arith.addf %303, %308 : vector<8x256xf32>
    %c0_121 = arith.constant 0 : index
    %c18 = arith.constant 18 : index
    %310 = vector.load %arg4[%c0_121, %c18] : memref<8x36xf32, #tpu.memory_space<vmem>>, vector<8x1xf32>
    %311 = vector.extract_strided_slice %87 {offsets = [2, 0], sizes = [1, 256], strides = [1, 1]} : vector<8x256xf32> to vector<1x256xf32>
    %312 = vector.broadcast %311 : vector<1x256xf32> to vector<8x256xf32>
    %313 = vector.broadcast %310 : vector<8x1xf32> to vector<8x256xf32>
    %314 = arith.mulf %312, %313 : vector<8x256xf32>
    %315 = arith.addf %309, %314 : vector<8x256xf32>
    %c0_122 = arith.constant 0 : index
    %c19 = arith.constant 19 : index
    %316 = vector.load %arg4[%c0_122, %c19] : memref<8x36xf32, #tpu.memory_space<vmem>>, vector<8x1xf32>
    %317 = vector.extract_strided_slice %87 {offsets = [3, 0], sizes = [1, 256], strides = [1, 1]} : vector<8x256xf32> to vector<1x256xf32>
    %318 = vector.broadcast %317 : vector<1x256xf32> to vector<8x256xf32>
    %319 = vector.broadcast %316 : vector<8x1xf32> to vector<8x256xf32>
    %320 = arith.mulf %318, %319 : vector<8x256xf32>
    %321 = arith.addf %315, %320 : vector<8x256xf32>
    %c0_123 = arith.constant 0 : index
    %c16_124 = arith.constant 16 : index
    %322 = vector.load %arg4[%c0_123, %c16_124] : memref<8x36xf32, #tpu.memory_space<vmem>>, vector<8x1xf32>
    %323 = vector.extract_strided_slice %87 {offsets = [4, 0], sizes = [1, 256], strides = [1, 1]} : vector<8x256xf32> to vector<1x256xf32>
    %324 = vector.broadcast %323 : vector<1x256xf32> to vector<8x256xf32>
    %325 = vector.broadcast %322 : vector<8x1xf32> to vector<8x256xf32>
    %326 = arith.mulf %324, %325 : vector<8x256xf32>
    %327 = arith.addf %297, %326 : vector<8x256xf32>
    %c0_125 = arith.constant 0 : index
    %c17_126 = arith.constant 17 : index
    %328 = vector.load %arg4[%c0_125, %c17_126] : memref<8x36xf32, #tpu.memory_space<vmem>>, vector<8x1xf32>
    %329 = vector.extract_strided_slice %87 {offsets = [5, 0], sizes = [1, 256], strides = [1, 1]} : vector<8x256xf32> to vector<1x256xf32>
    %330 = vector.broadcast %329 : vector<1x256xf32> to vector<8x256xf32>
    %331 = vector.broadcast %328 : vector<8x1xf32> to vector<8x256xf32>
    %332 = arith.mulf %330, %331 : vector<8x256xf32>
    %333 = arith.addf %327, %332 : vector<8x256xf32>
    %c0_127 = arith.constant 0 : index
    %c18_128 = arith.constant 18 : index
    %334 = vector.load %arg4[%c0_127, %c18_128] : memref<8x36xf32, #tpu.memory_space<vmem>>, vector<8x1xf32>
    %335 = vector.extract_strided_slice %87 {offsets = [6, 0], sizes = [1, 256], strides = [1, 1]} : vector<8x256xf32> to vector<1x256xf32>
    %336 = vector.broadcast %335 : vector<1x256xf32> to vector<8x256xf32>
    %337 = vector.broadcast %334 : vector<8x1xf32> to vector<8x256xf32>
    %338 = arith.mulf %336, %337 : vector<8x256xf32>
    %339 = arith.addf %333, %338 : vector<8x256xf32>
    %c0_129 = arith.constant 0 : index
    %c19_130 = arith.constant 19 : index
    %340 = vector.load %arg4[%c0_129, %c19_130] : memref<8x36xf32, #tpu.memory_space<vmem>>, vector<8x1xf32>
    %341 = vector.extract_strided_slice %87 {offsets = [7, 0], sizes = [1, 256], strides = [1, 1]} : vector<8x256xf32> to vector<1x256xf32>
    %342 = vector.broadcast %341 : vector<1x256xf32> to vector<8x256xf32>
    %343 = vector.broadcast %340 : vector<8x1xf32> to vector<8x256xf32>
    %344 = arith.mulf %342, %343 : vector<8x256xf32>
    %345 = arith.addf %339, %344 : vector<8x256xf32>
    %c255_i32_131 = arith.constant 255 : i32
    %346 = tpu.dynamic_rotate %87 by %c255_i32_131 dim 1 : vector<8x256xf32>, i32 -> vector<8x256xf32>
    %c5_132 = arith.constant 5 : index
    %c0_133 = arith.constant 0 : index
    %c0_134 = arith.constant 0 : index
    %347 = vector.load %arg5[%c5_132, %c0_133, %c0_134] : memref<9x1x256xf32, #tpu.memory_space<vmem>>, vector<1x1x256xf32>
    %348 = vector.shape_cast %347 : vector<1x1x256xf32> to vector<1x256xf32>
    %349 = vector.broadcast %348 : vector<1x256xf32> to vector<8x256xf32>
    %350 = arith.mulf %346, %349 : vector<8x256xf32>
    %c0_135 = arith.constant 0 : index
    %c20 = arith.constant 20 : index
    %351 = vector.load %arg4[%c0_135, %c20] : memref<8x36xf32, #tpu.memory_space<vmem>>, vector<8x1xf32>
    %352 = vector.extract_strided_slice %350 {offsets = [0, 0], sizes = [1, 256], strides = [1, 1]} : vector<8x256xf32> to vector<1x256xf32>
    %353 = vector.broadcast %352 : vector<1x256xf32> to vector<8x256xf32>
    %354 = vector.broadcast %351 : vector<8x1xf32> to vector<8x256xf32>
    %355 = arith.mulf %353, %354 : vector<8x256xf32>
    %356 = arith.addf %321, %355 : vector<8x256xf32>
    %c0_136 = arith.constant 0 : index
    %c21 = arith.constant 21 : index
    %357 = vector.load %arg4[%c0_136, %c21] : memref<8x36xf32, #tpu.memory_space<vmem>>, vector<8x1xf32>
    %358 = vector.extract_strided_slice %350 {offsets = [1, 0], sizes = [1, 256], strides = [1, 1]} : vector<8x256xf32> to vector<1x256xf32>
    %359 = vector.broadcast %358 : vector<1x256xf32> to vector<8x256xf32>
    %360 = vector.broadcast %357 : vector<8x1xf32> to vector<8x256xf32>
    %361 = arith.mulf %359, %360 : vector<8x256xf32>
    %362 = arith.addf %356, %361 : vector<8x256xf32>
    %c0_137 = arith.constant 0 : index
    %c22 = arith.constant 22 : index
    %363 = vector.load %arg4[%c0_137, %c22] : memref<8x36xf32, #tpu.memory_space<vmem>>, vector<8x1xf32>
    %364 = vector.extract_strided_slice %350 {offsets = [2, 0], sizes = [1, 256], strides = [1, 1]} : vector<8x256xf32> to vector<1x256xf32>
    %365 = vector.broadcast %364 : vector<1x256xf32> to vector<8x256xf32>
    %366 = vector.broadcast %363 : vector<8x1xf32> to vector<8x256xf32>
    %367 = arith.mulf %365, %366 : vector<8x256xf32>
    %368 = arith.addf %362, %367 : vector<8x256xf32>
    %c0_138 = arith.constant 0 : index
    %c23 = arith.constant 23 : index
    %369 = vector.load %arg4[%c0_138, %c23] : memref<8x36xf32, #tpu.memory_space<vmem>>, vector<8x1xf32>
    %370 = vector.extract_strided_slice %350 {offsets = [3, 0], sizes = [1, 256], strides = [1, 1]} : vector<8x256xf32> to vector<1x256xf32>
    %371 = vector.broadcast %370 : vector<1x256xf32> to vector<8x256xf32>
    %372 = vector.broadcast %369 : vector<8x1xf32> to vector<8x256xf32>
    %373 = arith.mulf %371, %372 : vector<8x256xf32>
    %374 = arith.addf %368, %373 : vector<8x256xf32>
    %c0_139 = arith.constant 0 : index
    %c20_140 = arith.constant 20 : index
    %375 = vector.load %arg4[%c0_139, %c20_140] : memref<8x36xf32, #tpu.memory_space<vmem>>, vector<8x1xf32>
    %376 = vector.extract_strided_slice %350 {offsets = [4, 0], sizes = [1, 256], strides = [1, 1]} : vector<8x256xf32> to vector<1x256xf32>
    %377 = vector.broadcast %376 : vector<1x256xf32> to vector<8x256xf32>
    %378 = vector.broadcast %375 : vector<8x1xf32> to vector<8x256xf32>
    %379 = arith.mulf %377, %378 : vector<8x256xf32>
    %380 = arith.addf %345, %379 : vector<8x256xf32>
    %c0_141 = arith.constant 0 : index
    %c21_142 = arith.constant 21 : index
    %381 = vector.load %arg4[%c0_141, %c21_142] : memref<8x36xf32, #tpu.memory_space<vmem>>, vector<8x1xf32>
    %382 = vector.extract_strided_slice %350 {offsets = [5, 0], sizes = [1, 256], strides = [1, 1]} : vector<8x256xf32> to vector<1x256xf32>
    %383 = vector.broadcast %382 : vector<1x256xf32> to vector<8x256xf32>
    %384 = vector.broadcast %381 : vector<8x1xf32> to vector<8x256xf32>
    %385 = arith.mulf %383, %384 : vector<8x256xf32>
    %386 = arith.addf %380, %385 : vector<8x256xf32>
    %c0_143 = arith.constant 0 : index
    %c22_144 = arith.constant 22 : index
    %387 = vector.load %arg4[%c0_143, %c22_144] : memref<8x36xf32, #tpu.memory_space<vmem>>, vector<8x1xf32>
    %388 = vector.extract_strided_slice %350 {offsets = [6, 0], sizes = [1, 256], strides = [1, 1]} : vector<8x256xf32> to vector<1x256xf32>
    %389 = vector.broadcast %388 : vector<1x256xf32> to vector<8x256xf32>
    %390 = vector.broadcast %387 : vector<8x1xf32> to vector<8x256xf32>
    %391 = arith.mulf %389, %390 : vector<8x256xf32>
    %392 = arith.addf %386, %391 : vector<8x256xf32>
    %c0_145 = arith.constant 0 : index
    %c23_146 = arith.constant 23 : index
    %393 = vector.load %arg4[%c0_145, %c23_146] : memref<8x36xf32, #tpu.memory_space<vmem>>, vector<8x1xf32>
    %394 = vector.extract_strided_slice %350 {offsets = [7, 0], sizes = [1, 256], strides = [1, 1]} : vector<8x256xf32> to vector<1x256xf32>
    %395 = vector.broadcast %394 : vector<1x256xf32> to vector<8x256xf32>
    %396 = vector.broadcast %393 : vector<8x1xf32> to vector<8x256xf32>
    %397 = arith.mulf %395, %396 : vector<8x256xf32>
    %398 = arith.addf %392, %397 : vector<8x256xf32>
    %c241_i32_147 = arith.constant 241 : i32
    %399 = tpu.dynamic_rotate %87 by %c241_i32_147 dim 1 : vector<8x256xf32>, i32 -> vector<8x256xf32>
    %c6_148 = arith.constant 6 : index
    %c0_149 = arith.constant 0 : index
    %c0_150 = arith.constant 0 : index
    %400 = vector.load %arg5[%c6_148, %c0_149, %c0_150] : memref<9x1x256xf32, #tpu.memory_space<vmem>>, vector<1x1x256xf32>
    %401 = vector.shape_cast %400 : vector<1x1x256xf32> to vector<1x256xf32>
    %402 = vector.broadcast %401 : vector<1x256xf32> to vector<8x256xf32>
    %403 = arith.mulf %399, %402 : vector<8x256xf32>
    %c0_151 = arith.constant 0 : index
    %c24 = arith.constant 24 : index
    %404 = vector.load %arg4[%c0_151, %c24] : memref<8x36xf32, #tpu.memory_space<vmem>>, vector<8x1xf32>
    %405 = vector.extract_strided_slice %403 {offsets = [0, 0], sizes = [1, 256], strides = [1, 1]} : vector<8x256xf32> to vector<1x256xf32>
    %406 = vector.broadcast %405 : vector<1x256xf32> to vector<8x256xf32>
    %407 = vector.broadcast %404 : vector<8x1xf32> to vector<8x256xf32>
    %408 = arith.mulf %406, %407 : vector<8x256xf32>
    %409 = arith.addf %374, %408 : vector<8x256xf32>
    %c0_152 = arith.constant 0 : index
    %c25 = arith.constant 25 : index
    %410 = vector.load %arg4[%c0_152, %c25] : memref<8x36xf32, #tpu.memory_space<vmem>>, vector<8x1xf32>
    %411 = vector.extract_strided_slice %403 {offsets = [1, 0], sizes = [1, 256], strides = [1, 1]} : vector<8x256xf32> to vector<1x256xf32>
    %412 = vector.broadcast %411 : vector<1x256xf32> to vector<8x256xf32>
    %413 = vector.broadcast %410 : vector<8x1xf32> to vector<8x256xf32>
    %414 = arith.mulf %412, %413 : vector<8x256xf32>
    %415 = arith.addf %409, %414 : vector<8x256xf32>
    %c0_153 = arith.constant 0 : index
    %c26 = arith.constant 26 : index
    %416 = vector.load %arg4[%c0_153, %c26] : memref<8x36xf32, #tpu.memory_space<vmem>>, vector<8x1xf32>
    %417 = vector.extract_strided_slice %403 {offsets = [2, 0], sizes = [1, 256], strides = [1, 1]} : vector<8x256xf32> to vector<1x256xf32>
    %418 = vector.broadcast %417 : vector<1x256xf32> to vector<8x256xf32>
    %419 = vector.broadcast %416 : vector<8x1xf32> to vector<8x256xf32>
    %420 = arith.mulf %418, %419 : vector<8x256xf32>
    %421 = arith.addf %415, %420 : vector<8x256xf32>
    %c0_154 = arith.constant 0 : index
    %c27 = arith.constant 27 : index
    %422 = vector.load %arg4[%c0_154, %c27] : memref<8x36xf32, #tpu.memory_space<vmem>>, vector<8x1xf32>
    %423 = vector.extract_strided_slice %403 {offsets = [3, 0], sizes = [1, 256], strides = [1, 1]} : vector<8x256xf32> to vector<1x256xf32>
    %424 = vector.broadcast %423 : vector<1x256xf32> to vector<8x256xf32>
    %425 = vector.broadcast %422 : vector<8x1xf32> to vector<8x256xf32>
    %426 = arith.mulf %424, %425 : vector<8x256xf32>
    %427 = arith.addf %421, %426 : vector<8x256xf32>
    %c0_155 = arith.constant 0 : index
    %c24_156 = arith.constant 24 : index
    %428 = vector.load %arg4[%c0_155, %c24_156] : memref<8x36xf32, #tpu.memory_space<vmem>>, vector<8x1xf32>
    %429 = vector.extract_strided_slice %403 {offsets = [4, 0], sizes = [1, 256], strides = [1, 1]} : vector<8x256xf32> to vector<1x256xf32>
    %430 = vector.broadcast %429 : vector<1x256xf32> to vector<8x256xf32>
    %431 = vector.broadcast %428 : vector<8x1xf32> to vector<8x256xf32>
    %432 = arith.mulf %430, %431 : vector<8x256xf32>
    %433 = arith.addf %398, %432 : vector<8x256xf32>
    %c0_157 = arith.constant 0 : index
    %c25_158 = arith.constant 25 : index
    %434 = vector.load %arg4[%c0_157, %c25_158] : memref<8x36xf32, #tpu.memory_space<vmem>>, vector<8x1xf32>
    %435 = vector.extract_strided_slice %403 {offsets = [5, 0], sizes = [1, 256], strides = [1, 1]} : vector<8x256xf32> to vector<1x256xf32>
    %436 = vector.broadcast %435 : vector<1x256xf32> to vector<8x256xf32>
    %437 = vector.broadcast %434 : vector<8x1xf32> to vector<8x256xf32>
    %438 = arith.mulf %436, %437 : vector<8x256xf32>
    %439 = arith.addf %433, %438 : vector<8x256xf32>
    %c0_159 = arith.constant 0 : index
    %c26_160 = arith.constant 26 : index
    %440 = vector.load %arg4[%c0_159, %c26_160] : memref<8x36xf32, #tpu.memory_space<vmem>>, vector<8x1xf32>
    %441 = vector.extract_strided_slice %403 {offsets = [6, 0], sizes = [1, 256], strides = [1, 1]} : vector<8x256xf32> to vector<1x256xf32>
    %442 = vector.broadcast %441 : vector<1x256xf32> to vector<8x256xf32>
    %443 = vector.broadcast %440 : vector<8x1xf32> to vector<8x256xf32>
    %444 = arith.mulf %442, %443 : vector<8x256xf32>
    %445 = arith.addf %439, %444 : vector<8x256xf32>
    %c0_161 = arith.constant 0 : index
    %c27_162 = arith.constant 27 : index
    %446 = vector.load %arg4[%c0_161, %c27_162] : memref<8x36xf32, #tpu.memory_space<vmem>>, vector<8x1xf32>
    %447 = vector.extract_strided_slice %403 {offsets = [7, 0], sizes = [1, 256], strides = [1, 1]} : vector<8x256xf32> to vector<1x256xf32>
    %448 = vector.broadcast %447 : vector<1x256xf32> to vector<8x256xf32>
    %449 = vector.broadcast %446 : vector<8x1xf32> to vector<8x256xf32>
    %450 = arith.mulf %448, %449 : vector<8x256xf32>
    %451 = arith.addf %445, %450 : vector<8x256xf32>
    %c240_i32_163 = arith.constant 240 : i32
    %452 = tpu.dynamic_rotate %87 by %c240_i32_163 dim 1 : vector<8x256xf32>, i32 -> vector<8x256xf32>
    %c7_164 = arith.constant 7 : index
    %c0_165 = arith.constant 0 : index
    %c0_166 = arith.constant 0 : index
    %453 = vector.load %arg5[%c7_164, %c0_165, %c0_166] : memref<9x1x256xf32, #tpu.memory_space<vmem>>, vector<1x1x256xf32>
    %454 = vector.shape_cast %453 : vector<1x1x256xf32> to vector<1x256xf32>
    %455 = vector.broadcast %454 : vector<1x256xf32> to vector<8x256xf32>
    %456 = arith.mulf %452, %455 : vector<8x256xf32>
    %c0_167 = arith.constant 0 : index
    %c28 = arith.constant 28 : index
    %457 = vector.load %arg4[%c0_167, %c28] : memref<8x36xf32, #tpu.memory_space<vmem>>, vector<8x1xf32>
    %458 = vector.extract_strided_slice %456 {offsets = [0, 0], sizes = [1, 256], strides = [1, 1]} : vector<8x256xf32> to vector<1x256xf32>
    %459 = vector.broadcast %458 : vector<1x256xf32> to vector<8x256xf32>
    %460 = vector.broadcast %457 : vector<8x1xf32> to vector<8x256xf32>
    %461 = arith.mulf %459, %460 : vector<8x256xf32>
    %462 = arith.addf %427, %461 : vector<8x256xf32>
    %c0_168 = arith.constant 0 : index
    %c29 = arith.constant 29 : index
    %463 = vector.load %arg4[%c0_168, %c29] : memref<8x36xf32, #tpu.memory_space<vmem>>, vector<8x1xf32>
    %464 = vector.extract_strided_slice %456 {offsets = [1, 0], sizes = [1, 256], strides = [1, 1]} : vector<8x256xf32> to vector<1x256xf32>
    %465 = vector.broadcast %464 : vector<1x256xf32> to vector<8x256xf32>
    %466 = vector.broadcast %463 : vector<8x1xf32> to vector<8x256xf32>
    %467 = arith.mulf %465, %466 : vector<8x256xf32>
    %468 = arith.addf %462, %467 : vector<8x256xf32>
    %c0_169 = arith.constant 0 : index
    %c30 = arith.constant 30 : index
    %469 = vector.load %arg4[%c0_169, %c30] : memref<8x36xf32, #tpu.memory_space<vmem>>, vector<8x1xf32>
    %470 = vector.extract_strided_slice %456 {offsets = [2, 0], sizes = [1, 256], strides = [1, 1]} : vector<8x256xf32> to vector<1x256xf32>
    %471 = vector.broadcast %470 : vector<1x256xf32> to vector<8x256xf32>
    %472 = vector.broadcast %469 : vector<8x1xf32> to vector<8x256xf32>
    %473 = arith.mulf %471, %472 : vector<8x256xf32>
    %474 = arith.addf %468, %473 : vector<8x256xf32>
    %c0_170 = arith.constant 0 : index
    %c31 = arith.constant 31 : index
    %475 = vector.load %arg4[%c0_170, %c31] : memref<8x36xf32, #tpu.memory_space<vmem>>, vector<8x1xf32>
    %476 = vector.extract_strided_slice %456 {offsets = [3, 0], sizes = [1, 256], strides = [1, 1]} : vector<8x256xf32> to vector<1x256xf32>
    %477 = vector.broadcast %476 : vector<1x256xf32> to vector<8x256xf32>
    %478 = vector.broadcast %475 : vector<8x1xf32> to vector<8x256xf32>
    %479 = arith.mulf %477, %478 : vector<8x256xf32>
    %480 = arith.addf %474, %479 : vector<8x256xf32>
    %c0_171 = arith.constant 0 : index
    %c28_172 = arith.constant 28 : index
    %481 = vector.load %arg4[%c0_171, %c28_172] : memref<8x36xf32, #tpu.memory_space<vmem>>, vector<8x1xf32>
    %482 = vector.extract_strided_slice %456 {offsets = [4, 0], sizes = [1, 256], strides = [1, 1]} : vector<8x256xf32> to vector<1x256xf32>
    %483 = vector.broadcast %482 : vector<1x256xf32> to vector<8x256xf32>
    %484 = vector.broadcast %481 : vector<8x1xf32> to vector<8x256xf32>
    %485 = arith.mulf %483, %484 : vector<8x256xf32>
    %486 = arith.addf %451, %485 : vector<8x256xf32>
    %c0_173 = arith.constant 0 : index
    %c29_174 = arith.constant 29 : index
    %487 = vector.load %arg4[%c0_173, %c29_174] : memref<8x36xf32, #tpu.memory_space<vmem>>, vector<8x1xf32>
    %488 = vector.extract_strided_slice %456 {offsets = [5, 0], sizes = [1, 256], strides = [1, 1]} : vector<8x256xf32> to vector<1x256xf32>
    %489 = vector.broadcast %488 : vector<1x256xf32> to vector<8x256xf32>
    %490 = vector.broadcast %487 : vector<8x1xf32> to vector<8x256xf32>
    %491 = arith.mulf %489, %490 : vector<8x256xf32>
    %492 = arith.addf %486, %491 : vector<8x256xf32>
    %c0_175 = arith.constant 0 : index
    %c30_176 = arith.constant 30 : index
    %493 = vector.load %arg4[%c0_175, %c30_176] : memref<8x36xf32, #tpu.memory_space<vmem>>, vector<8x1xf32>
    %494 = vector.extract_strided_slice %456 {offsets = [6, 0], sizes = [1, 256], strides = [1, 1]} : vector<8x256xf32> to vector<1x256xf32>
    %495 = vector.broadcast %494 : vector<1x256xf32> to vector<8x256xf32>
    %496 = vector.broadcast %493 : vector<8x1xf32> to vector<8x256xf32>
    %497 = arith.mulf %495, %496 : vector<8x256xf32>
    %498 = arith.addf %492, %497 : vector<8x256xf32>
    %c0_177 = arith.constant 0 : index
    %c31_178 = arith.constant 31 : index
    %499 = vector.load %arg4[%c0_177, %c31_178] : memref<8x36xf32, #tpu.memory_space<vmem>>, vector<8x1xf32>
    %500 = vector.extract_strided_slice %456 {offsets = [7, 0], sizes = [1, 256], strides = [1, 1]} : vector<8x256xf32> to vector<1x256xf32>
    %501 = vector.broadcast %500 : vector<1x256xf32> to vector<8x256xf32>
    %502 = vector.broadcast %499 : vector<8x1xf32> to vector<8x256xf32>
    %503 = arith.mulf %501, %502 : vector<8x256xf32>
    %504 = arith.addf %498, %503 : vector<8x256xf32>
    %c239_i32_179 = arith.constant 239 : i32
    %505 = tpu.dynamic_rotate %87 by %c239_i32_179 dim 1 : vector<8x256xf32>, i32 -> vector<8x256xf32>
    %c8_180 = arith.constant 8 : index
    %c0_181 = arith.constant 0 : index
    %c0_182 = arith.constant 0 : index
    %506 = vector.load %arg5[%c8_180, %c0_181, %c0_182] : memref<9x1x256xf32, #tpu.memory_space<vmem>>, vector<1x1x256xf32>
    %507 = vector.shape_cast %506 : vector<1x1x256xf32> to vector<1x256xf32>
    %508 = vector.broadcast %507 : vector<1x256xf32> to vector<8x256xf32>
    %509 = arith.mulf %505, %508 : vector<8x256xf32>
    %c0_183 = arith.constant 0 : index
    %c32 = arith.constant 32 : index
    %510 = vector.load %arg4[%c0_183, %c32] : memref<8x36xf32, #tpu.memory_space<vmem>>, vector<8x1xf32>
    %511 = vector.extract_strided_slice %509 {offsets = [0, 0], sizes = [1, 256], strides = [1, 1]} : vector<8x256xf32> to vector<1x256xf32>
    %512 = vector.broadcast %511 : vector<1x256xf32> to vector<8x256xf32>
    %513 = vector.broadcast %510 : vector<8x1xf32> to vector<8x256xf32>
    %514 = arith.mulf %512, %513 : vector<8x256xf32>
    %515 = arith.addf %480, %514 : vector<8x256xf32>
    %c0_184 = arith.constant 0 : index
    %c33 = arith.constant 33 : index
    %516 = vector.load %arg4[%c0_184, %c33] : memref<8x36xf32, #tpu.memory_space<vmem>>, vector<8x1xf32>
    %517 = vector.extract_strided_slice %509 {offsets = [1, 0], sizes = [1, 256], strides = [1, 1]} : vector<8x256xf32> to vector<1x256xf32>
    %518 = vector.broadcast %517 : vector<1x256xf32> to vector<8x256xf32>
    %519 = vector.broadcast %516 : vector<8x1xf32> to vector<8x256xf32>
    %520 = arith.mulf %518, %519 : vector<8x256xf32>
    %521 = arith.addf %515, %520 : vector<8x256xf32>
    %c0_185 = arith.constant 0 : index
    %c34 = arith.constant 34 : index
    %522 = vector.load %arg4[%c0_185, %c34] : memref<8x36xf32, #tpu.memory_space<vmem>>, vector<8x1xf32>
    %523 = vector.extract_strided_slice %509 {offsets = [2, 0], sizes = [1, 256], strides = [1, 1]} : vector<8x256xf32> to vector<1x256xf32>
    %524 = vector.broadcast %523 : vector<1x256xf32> to vector<8x256xf32>
    %525 = vector.broadcast %522 : vector<8x1xf32> to vector<8x256xf32>
    %526 = arith.mulf %524, %525 : vector<8x256xf32>
    %527 = arith.addf %521, %526 : vector<8x256xf32>
    %c0_186 = arith.constant 0 : index
    %c35 = arith.constant 35 : index
    %528 = vector.load %arg4[%c0_186, %c35] : memref<8x36xf32, #tpu.memory_space<vmem>>, vector<8x1xf32>
    %529 = vector.extract_strided_slice %509 {offsets = [3, 0], sizes = [1, 256], strides = [1, 1]} : vector<8x256xf32> to vector<1x256xf32>
    %530 = vector.broadcast %529 : vector<1x256xf32> to vector<8x256xf32>
    %531 = vector.broadcast %528 : vector<8x1xf32> to vector<8x256xf32>
    %532 = arith.mulf %530, %531 : vector<8x256xf32>
    %533 = arith.addf %527, %532 : vector<8x256xf32>
    %c0_187 = arith.constant 0 : index
    %c32_188 = arith.constant 32 : index
    %534 = vector.load %arg4[%c0_187, %c32_188] : memref<8x36xf32, #tpu.memory_space<vmem>>, vector<8x1xf32>
    %535 = vector.extract_strided_slice %509 {offsets = [4, 0], sizes = [1, 256], strides = [1, 1]} : vector<8x256xf32> to vector<1x256xf32>
    %536 = vector.broadcast %535 : vector<1x256xf32> to vector<8x256xf32>
    %537 = vector.broadcast %534 : vector<8x1xf32> to vector<8x256xf32>
    %538 = arith.mulf %536, %537 : vector<8x256xf32>
    %539 = arith.addf %504, %538 : vector<8x256xf32>
    %c0_189 = arith.constant 0 : index
    %c33_190 = arith.constant 33 : index
    %540 = vector.load %arg4[%c0_189, %c33_190] : memref<8x36xf32, #tpu.memory_space<vmem>>, vector<8x1xf32>
    %541 = vector.extract_strided_slice %509 {offsets = [5, 0], sizes = [1, 256], strides = [1, 1]} : vector<8x256xf32> to vector<1x256xf32>
    %542 = vector.broadcast %541 : vector<1x256xf32> to vector<8x256xf32>
    %543 = vector.broadcast %540 : vector<8x1xf32> to vector<8x256xf32>
    %544 = arith.mulf %542, %543 : vector<8x256xf32>
    %545 = arith.addf %539, %544 : vector<8x256xf32>
    %c0_191 = arith.constant 0 : index
    %c34_192 = arith.constant 34 : index
    %546 = vector.load %arg4[%c0_191, %c34_192] : memref<8x36xf32, #tpu.memory_space<vmem>>, vector<8x1xf32>
    %547 = vector.extract_strided_slice %509 {offsets = [6, 0], sizes = [1, 256], strides = [1, 1]} : vector<8x256xf32> to vector<1x256xf32>
    %548 = vector.broadcast %547 : vector<1x256xf32> to vector<8x256xf32>
    %549 = vector.broadcast %546 : vector<8x1xf32> to vector<8x256xf32>
    %550 = arith.mulf %548, %549 : vector<8x256xf32>
    %551 = arith.addf %545, %550 : vector<8x256xf32>
    %c0_193 = arith.constant 0 : index
    %c35_194 = arith.constant 35 : index
    %552 = vector.load %arg4[%c0_193, %c35_194] : memref<8x36xf32, #tpu.memory_space<vmem>>, vector<8x1xf32>
    %553 = vector.extract_strided_slice %509 {offsets = [7, 0], sizes = [1, 256], strides = [1, 1]} : vector<8x256xf32> to vector<1x256xf32>
    %554 = vector.broadcast %553 : vector<1x256xf32> to vector<8x256xf32>
    %555 = vector.broadcast %552 : vector<8x1xf32> to vector<8x256xf32>
    %556 = arith.mulf %554, %555 : vector<8x256xf32>
    %557 = arith.addf %551, %556 : vector<8x256xf32>
    %c0_195 = arith.constant 0 : index
    %c0_196 = arith.constant 0 : index
    %558 = vector.load %arg6[%c0_195, %c0_196] : memref<8x1xf32, #tpu.memory_space<vmem>>, vector<8x1xf32>
    %559 = vector.broadcast %558 : vector<8x1xf32> to vector<8x256xf32>
    %560 = arith.addf %533, %559 : vector<8x256xf32>
    %cst = arith.constant 0.000000e+00 : f32
    %561 = vector.broadcast %cst : f32 to vector<8x256xf32>
    %562 = arith.maximumf %560, %561 : vector<8x256xf32>
    %c0_197 = arith.constant 0 : index
    %c0_198 = arith.constant 0 : index
    %c0_199 = arith.constant 0 : index
    %563 = vector.load %arg7[%c0_197, %c0_198, %c0_199] : memref<2x8x256xf32, #tpu.memory_space<vmem>>, vector<1x8x256xf32>
    %564 = vector.shape_cast %563 : vector<1x8x256xf32> to vector<8x256xf32>
    %565 = vector.shape_cast %562 : vector<8x256xf32> to vector<1x8x256xf32>
    tpu.vector_store %arg7[%c0_197, %c0_198, %c0_199], %565 {strides = array<i32>} : memref<2x8x256xf32, #tpu.memory_space<vmem>>, vector<1x8x256xf32>,
    %566 = vector.broadcast %558 : vector<8x1xf32> to vector<8x256xf32>
    %567 = arith.addf %557, %566 : vector<8x256xf32>
    %cst_200 = arith.constant 0.000000e+00 : f32
    %568 = vector.broadcast %cst_200 : f32 to vector<8x256xf32>
    %569 = arith.maximumf %567, %568 : vector<8x256xf32>
    %c1_201 = arith.constant 1 : index
    %c0_202 = arith.constant 0 : index
    %c0_203 = arith.constant 0 : index
    %570 = vector.load %arg7[%c1_201, %c0_202, %c0_203] : memref<2x8x256xf32, #tpu.memory_space<vmem>>, vector<1x8x256xf32>
    %571 = vector.shape_cast %570 : vector<1x8x256xf32> to vector<8x256xf32>
    %572 = vector.shape_cast %569 : vector<8x256xf32> to vector<1x8x256xf32>
    tpu.vector_store %arg7[%c1_201, %c0_202, %c0_203], %572 {strides = array<i32>} : memref<2x8x256xf32, #tpu.memory_space<vmem>>, vector<1x8x256xf32>,
    return
  }
  func.func @transform_0(%arg0: i32) -> (i32, i32) {
    %c0_i32 = arith.constant 0 : i32
    %c0_i32_0 = arith.constant 0 : i32
    return %arg0, %c0_i32 : i32, i32
  }
  func.func @transform_1(%arg0: i32) -> (i32, i32, i32) {
    %c0_i32 = arith.constant 0 : i32
    %c0_i32_0 = arith.constant 0 : i32
    %c0_i32_1 = arith.constant 0 : i32
    %c0_i32_2 = arith.constant 0 : i32
    return %c0_i32, %c0_i32_0, %c0_i32_1 : i32, i32, i32
  }
  func.func @transform_2(%arg0: i32) -> (i32, i32) {
    %c0_i32 = arith.constant 0 : i32
    %c0_i32_0 = arith.constant 0 : i32
    %c0_i32_1 = arith.constant 0 : i32
    return %c0_i32, %c0_i32_0 : i32, i32
  }
  func.func @transform_3(%arg0: i32) -> (i32, i32) {
    %c0_i32 = arith.constant 0 : i32
    %c0_i32_0 = arith.constant 0 : i32
    %c0_i32_1 = arith.constant 0 : i32
    return %c0_i32, %c0_i32_0 : i32, i32
  }
  func.func @transform_4(%arg0: i32) -> (i32, i32, i32) {
    %c0_i32 = arith.constant 0 : i32
    %c0_i32_0 = arith.constant 0 : i32
    %c0_i32_1 = arith.constant 0 : i32
    %c0_i32_2 = arith.constant 0 : i32
    return %c0_i32, %c0_i32_0, %c0_i32_1 : i32, i32, i32
  }
  func.func @transform_5(%arg0: i32) -> (i32, i32) {
    %c0_i32 = arith.constant 0 : i32
    %c0_i32_0 = arith.constant 0 : i32
    %c0_i32_1 = arith.constant 0 : i32
    return %c0_i32, %c0_i32_0 : i32, i32
  }
  func.func @transform_6(%arg0: i32) -> (i32, i32, i32) {
    %c0_i32 = arith.constant 0 : i32
    %c0_i32_0 = arith.constant 0 : i32
    %c0_i32_1 = arith.constant 0 : i32
    return %arg0, %c0_i32, %c0_i32_0 : i32, i32, i32
  }
}

</mosaic_0001>

<bundles_post_ra>
// kernel: depthconv_forward.1
= control target key start
LH: loop header
LB: loop body
LE: loop exit
PB: predicated region body
PF: predicated region fallthrough
CT: control target
= control target key end

     0   :  { %v1499_v0 = vmov 0   ;;  %s1500_s25 = smov 17   ;;  %s1501_s30 = smov 16   ;;  %v1508_v14 = vmov 1   ;;  %v1509_v15 = vmov 2   ;;  %v1510_v16 = vmov 3   ;;  %s2556_s1 = inlined_call_operand.vmem [shape: f32[9,8,1], index: 1, kind: input, shape index: {}]   ;;  %s2557_s0 = inlined_call_operand.vmem [shape: f32[8,256], index: 0, kind: input, shape index: {}]   ;;  %s2558_s2 = inlined_call_operand.vmem [shape: f32[8,1], index: 2, kind: input, shape index: {}]   ;;  %s2559_s3 = inlined_call_operand.vmem [shape: f32[8,36], index: 3, kind: input, shape index: {}]   ;;  %s2560_s4 = inlined_call_operand.vmem [shape: f32[9,1,256], index: 4, kind: input, shape index: {}]   ;;  %s2561_s5 = inlined_call_operand.vmem [shape: f32[8,1], index: 5, kind: input, shape index: {}]   ;;  %s2562_s6 = inlined_call_operand.vmem [shape: f32[2,8,256], index: 6, kind: output, shape index: {}]  }
   0x1   :  { %1460 = vset.pattern.permute.xlu0 %v1499_v0  ;;  %v1399_v1 = vld [vmem:[%s2556_s1 + $0x20] sm:$0xff]  ;;  %v1585_v2 = vld [vmem:[%s2557_s0 + $0x8] sm:$0xff]  ;;  %1461 = vset.pattern.permute.xlu1 %v1499_v0  ;;  %s1502_s9 = smov 15   ;;  %v1403_v6 = vld [vmem:[%s2556_s1 + $0x10] sm:$0xff]  ;;  %s1503_s11 = smov 1   ;;  %v1511_v17 = vmov 5   ;;  %v38_v44 = vlaneseq }
   0x2   :  { %29 = vperm.xlu0 %1460, %v1399_v1   ;;  %36 = vrot.lane.b32.xlu1 %v1585_v2, %s1500_s25  ;;  %v57_v3 = vld [vmem:[%s2556_s1] sm:$0xff]  ;;  %v1401_v5 = vld [vmem:[%s2556_s1 + $0x8] sm:$0xff]  ;;  %v1405_v7 = vld [vmem:[%s2556_s1 + $0x18] sm:$0xff]  ;;  %s1504_s14 = smov 127   ;;  %s1505_s19 = smov 113   ;;  %v1512_v18 = vmov 4  }
   0x3   :  { %v1596_v4 = vld [vmem:[%s2557_s0] sm:$0xff]  ;;  %v1407_v8 = vld [vmem:[%s2556_s1 + $0x28] sm:$0xff]  ;;  %v1409_v9 = vld [vmem:[%s2556_s1 + $0x30] sm:$0xff]  ;;  %s1506_s22 = smov 112   ;;  %s1507_s26 = smov 111   ;;  %v1513_v19 = vmov 8  }
   0x4   :  { %v1411_v10 = vld [vmem:[%s2556_s1 + $0x38] sm:$0xff]  ;;  %v1413_v11 = vld [vmem:[%s2556_s1 + $0x40] sm:$0xff]  ;;  %v1514_v20 = vmov 6   ;;  %v1515_v21 = vmov 11   ;;  %v1516_v22 = vmov 7   ;;  %v1517_v23 = vmov 12  }
   0x5   :  { %v298_v12 = vld [vmem:[%s2558_s2] sm:$0xff]  ;;  %v1518_v24 = vmov 9   ;;  %v1519_v25 = vmov 15   ;;  %v1520_v26 = vmov 10   ;;  %v1521_v27 = vmov 18  }
   0x6   :  { %60 = vperm.xlu1 %1461, %v57_v3   ;;  %34 = vrot.lane.b32.xlu0 %v1596_v4, %s1500_s25  ;;  %v1655_v13 = vld [vmem:[%s2559_s3] sm:$0xff]  ;;  %v1522_v28 = vmov 13   ;;  %v1523_v29 = vmov 21   ;;  %v1524_v30 = vmov 14   ;;  %v1525_v31 = vmov 16  }
   0x7   :  { %v1526_v32 = vmov 17   ;;  %v1527_v33 = vmov 19   ;;  %v1528_v34 = vmov 20   ;;  %v1529_v35 = vmov 22   ;;  %v43_v53 = vld [vmem:[%s2560_s4] sm:$0x3] }
   0x8   :  { %v1684_v47 = vshrl.u32 %v38_v44, 7  ;;  %v1686_v48 = vand.u32 127, %v38_v44  ;;  %v1400_v58 = vld [vmem:[%s2560_s4 + $0x2] sm:$0x3]  ;;  %v1402_v61 = vld [vmem:[%s2560_s4 + $0x4] sm:$0x3] }
   0x9   :  { %v1404_v62 = vld [vmem:[%s2560_s4 + $0x6] sm:$0x3] }
   0xa   :  { %69 = vrot.lane.b32.xlu1 %v1585_v2, %s1501_s30  ;;  %67 = vrot.lane.b32.xlu0 %v1596_v4, %s1501_s30  ;;  %v1689_v51 = vsub.s32 0, %v1684_v47  ;;  %v1692_v52 = vsub.s32 1, %v1684_v47  ;;  %vm40_vm0 = vcmp.lt.s32.totalorder %v1686_v48, 17  ;;  %vm71_vm1 = vcmp.lt.s32.totalorder %v1686_v48, 16 }
   0xb   :  { %vm104_vm2 = vcmp.lt.s32.totalorder %v1686_v48, 15  ;;  %vm137_vm3 = vcmp.lt.s32.totalorder %v1686_v48, 1  ;;  %vm170_vm4 = vcmp.lt.s32.totalorder %v1686_v48, 127  ;;  %vm203_vm5 = vcmp.lt.s32.totalorder %v1686_v48, 113 }
   0xc   :  { %v1701_v56 = vrot.slane %v43_v53, %v1689_v51  ;;  %v1704_v57 = vrot.slane %v43_v53, %v1692_v52  ;;  %v1723_v3 = vrot.slane %v1400_v58, %v1689_v51  ;;  %vm236_vm6 = vcmp.lt.s32.totalorder %v1686_v48, 112 }
   0xd   :  { %vm269_vm7 = vcmp.lt.s32.totalorder %v1686_v48, 111 }
   0xe   :  { %100 = vrot.lane.b32.xlu1 %v1596_v4, %s1502_s9  ;;  %93 = vperm.xlu0 %1460, %v1401_v5   ;;  %v1726_v5 = vrot.slane %v1400_v58, %v1692_v52 }
  0x12   :  { %126 = vperm.xlu1 %1461, %v1403_v6   ;;  %102 = vrot.lane.b32.xlu0 %v1585_v2, %s1502_s9 }
  0x16   :  { %135 = vrot.lane.b32.xlu1 %v1585_v2, %s1503_s11  ;;  %133 = vrot.lane.b32.xlu0 %v1596_v4, %s1503_s11 }
  0x1a   :  { %166 = vrot.lane.b32.xlu1 %v1596_v4, %s1504_s14  ;;  %159 = vperm.xlu0 %1460, %v1405_v7  }
  0x1e   :  { %168 = vrot.lane.b32.xlu1 %v1585_v2, %s1504_s14  ;;  %192 = vperm.xlu0 %1460, %v1407_v8  }
  0x22   :  { %199 = vrot.lane.b32.xlu1 %v1596_v4, %s1505_s19  ;;  %225 = vperm.xlu0 %1460, %v1409_v9  }
  0x26   :  { %258 = vperm.xlu1 %1461, %v1411_v10   ;;  %201 = vrot.lane.b32.xlu0 %v1585_v2, %s1505_s19  ;;  %v1406_v10 = vld [vmem:[%s2560_s4 + $0xa] sm:$0x3] }
  0x2a   :  { %234 = vrot.lane.b32.xlu1 %v1585_v2, %s1506_s22  ;;  %232 = vrot.lane.b32.xlu0 %v1596_v4, %s1506_s22 }
  0x2e   :  { %265 = vrot.lane.b32.xlu1 %v1596_v4, %s1507_s26  ;;  %291 = vperm.xlu0 %1460, %v1413_v11   ;;  %v1739_v11 = vrot.slane %v1402_v61, %v1689_v51 }
  0x32   :  { %301 = vperm.xlu1 %1461, %v298_v12   ;;  %267 = vrot.lane.b32.xlu0 %v1585_v2, %s1507_s26  ;;  %v1742_v12 = vrot.slane %v1402_v61, %v1692_v52 }
  0x36   :  { %1462 = vset.pattern.permute.xlu1 %v1508_v14  ;;  %325 = vperm.xlu0 %1460, %v1655_v13   ;;  %v1746_v14 = vrot.slane %v1404_v62, %v1689_v51 }
  0x37   :  { %339 = vperm.xlu1 %1462, %v1655_v13  }
  0x3a   :  { %1463 = vset.pattern.permute.xlu0 %v1509_v15  ;;  %v1408_v15 = vld [vmem:[%s2560_s4 + $0xc] sm:$0x3] }
  0x3b   :  { %1464 = vset.pattern.permute.xlu1 %v1510_v16  ;;  %355 = vperm.xlu0 %1463, %v1655_v13  }
  0x3c   :  { %371 = vperm.xlu1 %1464, %v1655_v13  }
  0x3f   :  { %1466 = vset.pattern.permute.xlu0 %v1511_v17 }
  0x40   :  { %1465 = vset.pattern.permute.xlu1 %v1512_v18  ;;  %457 = vperm.xlu0 %1466, %v1655_v13   ;;  %v1756_v18 = vrot.slane %v1404_v62, %v1692_v52 }
  0x41   :  { %441 = vperm.xlu1 %1465, %v1655_v13  }
  0x44   :  { %1469 = vset.pattern.permute.xlu0 %v1513_v19 }
  0x45   :  { %1467 = vset.pattern.permute.xlu1 %v1514_v20  ;;  %561 = vperm.xlu0 %1469, %v1655_v13  }
  0x46   :  { %473 = vperm.xlu1 %1467, %v1655_v13  }
  0x49   :  { %1472 = vset.pattern.permute.xlu0 %v1515_v21 }
  0x4a   :  { %1468 = vset.pattern.permute.xlu1 %v1516_v22  ;;  %609 = vperm.xlu0 %1472, %v1655_v13  }
  0x4b   :  { %489 = vperm.xlu1 %1468, %v1655_v13  }
  0x4e   :  { %1473 = vset.pattern.permute.xlu0 %v1517_v23  ;;  %v1762_v23 = vrot.slane %v1406_v10, %v1689_v51 }
  0x4f   :  { %1470 = vset.pattern.permute.xlu1 %v1518_v24  ;;  %681 = vperm.xlu0 %1473, %v1655_v13   ;;  %v1765_v24 = vrot.slane %v1406_v10, %v1692_v52 }
  0x50   :  { %577 = vperm.xlu1 %1470, %v1655_v13  }
  0x51   :  { %2573 = vst [vmem:[#allocation2_spill] sm:$0xff] %v1765_v24 }
  0x53   :  { %1476 = vset.pattern.permute.xlu0 %v1519_v25 }
  0x54   :  { %1471 = vset.pattern.permute.xlu1 %v1520_v26  ;;  %729 = vperm.xlu0 %1476, %v1655_v13  }
  0x55   :  { %593 = vperm.xlu1 %1471, %v1655_v13  }
  0x58   :  { %1479 = vset.pattern.permute.xlu0 %v1521_v27  ;;  %v1769_v27 = vrot.slane %v1408_v15, %v1689_v51 }
  0x59   :  { %1474 = vset.pattern.permute.xlu1 %v1522_v28  ;;  %825 = vperm.xlu0 %1479, %v1655_v13  }
  0x5a   :  { %697 = vperm.xlu1 %1474, %v1655_v13   ;;  %2574 = vst [vmem:[#allocation3_spill] sm:$0xff] %v1769_v27 }
  0x5d   :  { %1482 = vset.pattern.permute.xlu0 %v1523_v29 }
  0x5e   :  { %1475 = vset.pattern.permute.xlu1 %v1524_v30 }
  0x5f   :  { %713 = vperm.xlu1 %1475, %v1655_v13  }
  0x63   :  { %1477 = vset.pattern.permute.xlu1 %v1525_v31 }
  0x64   :  { %793 = vperm.xlu1 %1477, %v1655_v13  }
  0x68   :  { %1478 = vset.pattern.permute.xlu1 %v1526_v32 }
  0x69   :  { %809 = vperm.xlu1 %1478, %v1655_v13  }
  0x6d   :  { %1480 = vset.pattern.permute.xlu1 %v1527_v33 }
  0x6e   :  { %841 = vperm.xlu1 %1480, %v1655_v13  }
  0x72   :  { %1481 = vset.pattern.permute.xlu1 %v1528_v34 }
  0x73   :  { %913 = vperm.xlu1 %1481, %v1655_v13  }
  0x74   :  { %v37_v36 = vpop.permute.xlu1 %36 }
  0x77   :  { %1483 = vset.pattern.permute.xlu1 %v1529_v35  ;;  %v1782_v35 = vrot.slane %v1408_v15, %v1692_v52  ;;  %v1412_v15 = vld [vmem:[%s2560_s4 + $0x10] sm:$0x3] }
  0x79   :  { %2575 = vst [vmem:[#allocation4_spill] sm:$0xff] %v1782_v35 }
  0x7d   :  { %v1678_v37 = vpop.permute.xlu0 %29 }
  0x7e   :  { %v32_v32 = vmul.f32 %v1678_v37, %v1596_v4  ;;  %v33_v33 = vmul.f32 %v1678_v37, %v1585_v2  ;;  %v1410_v2 = vld [vmem:[%s2560_s4 + $0xe] sm:$0x3] }
  0x81   :  { %v61_v38 = vpop.permute.xlu1 %60  ;;  %v35_v39 = vpop.permute.xlu0 %34 }
  0x82   :  { %v41_v59 = vsel %vm40_vm0, %v35_v39, %v37_v36  ;;  %v42_v60 = vsel %vm40_vm0, %v37_v36, %v35_v39 }
  0x83   :  { %v55_v6 = vmul.f32 %v1701_v56, %v42_v60  ;;  %v56_v7 = vmul.f32 %v1704_v57, %v41_v59  ;;  %v1805_v59 = vrot.slane %v1410_v2, %v1689_v51  ;;  %v1808_v60 = vrot.slane %v1410_v2, %v1692_v52 }
  0x85   :  { %v70_v40 = vpop.permute.xlu1 %69  ;;  %v68_v41 = vpop.permute.xlu0 %67  ;;  %v63_v25 = vmul.f32 %v61_v38, %v55_v6  ;;  %v64_v26 = vmul.f32 %v61_v38, %v56_v7  ;;  %2576 = vst [vmem:[#allocation5_spill] sm:$0xff] %v1805_v59  ;;  %2577 = vst [vmem:[#allocation6_spill] sm:$0xff] %v1808_v60 }
  0x86   :  { %v72_v8 = vsel %vm71_vm1, %v68_v41, %v70_v40  ;;  %v73_v9 = vsel %vm71_vm1, %v70_v40, %v68_v41 }
  0x87   :  { %v87_v21 = vmul.f32 %v1723_v3, %v73_v9  ;;  %v88_v22 = vmul.f32 %v1726_v5, %v72_v8  ;;  %v66_v37 = vadd.f32 %v64_v26, %v33_v33  ;;  %v65_v41 = vadd.f32 %v63_v25, %v32_v32 }
  0x89   :  { %v101_v42 = vpop.permute.xlu1 %100  ;;  %v1680_v43 = vpop.permute.xlu0 %93 }
  0x8a   :  { %v96_v38 = vmul.f32 %v1680_v43, %v87_v21  ;;  %v97_v39 = vmul.f32 %v1680_v43, %v88_v22 }
  0x8c   :  { %v98_v62 = vadd.f32 %v96_v38, %v65_v41 }
  0x8d   :  { %v1682_v45 = vpop.permute.xlu1 %126  ;;  %v103_v46 = vpop.permute.xlu0 %102 }
  0x8e   :  { %v105_v16 = vsel %vm104_vm2, %v101_v42, %v103_v46  ;;  %v106_v17 = vsel %vm104_vm2, %v103_v46, %v101_v42 }
  0x8f   :  { %v120_v28 = vmul.f32 %v1739_v11, %v106_v17  ;;  %v121_v29 = vmul.f32 %v1742_v12, %v105_v16 }
  0x91   :  { %v136_v49 = vpop.permute.xlu1 %135  ;;  %v134_v50 = vpop.permute.xlu0 %133  ;;  %v129_v46 = vmul.f32 %v1682_v45, %v120_v28  ;;  %v130_v43 = vmul.f32 %v1682_v45, %v121_v29  ;;  %v99_v45 = vadd.f32 %v97_v39, %v66_v37  ;;  %v1830_v28 = vrot.slane %v1412_v15, %v1692_v52 }
  0x92   :  { %v138_v30 = vsel %vm137_vm3, %v134_v50, %v136_v49  ;;  %v139_v31 = vsel %vm137_vm3, %v136_v49, %v134_v50 }
  0x93   :  { %v153_v42 = vmul.f32 %v1746_v14, %v139_v31  ;;  %v154_v44 = vmul.f32 %v1756_v18, %v138_v30  ;;  %v132_v16 = vadd.f32 %v130_v43, %v99_v45  ;;  %v131_v17 = vadd.f32 %v129_v46, %v98_v62  ;;  %2579 = vst [vmem:[#allocation8_spill] sm:$0xff] %v1830_v28 }
  0x94   :  { %v1530_v45 = vmov 23  }
  0x95   :  { %v167_v54 = vpop.permute.xlu1 %166  ;;  %v1698_v55 = vpop.permute.xlu0 %159 }
  0x96   :  { %v162_v7 = vmul.f32 %v1698_v55, %v153_v42  ;;  %v163_v8 = vmul.f32 %v1698_v55, %v154_v44  ;;  %v1827_v55 = vrot.slane %v1412_v15, %v1689_v51  ;;  %v1536_v15 = vmov 31  }
  0x98   :  { %2578 = vst [vmem:[#allocation7_spill] sm:$0xff] %v1827_v55  ;;  %v164_v29 = vadd.f32 %v162_v7, %v131_v17  ;;  %v165_v30 = vadd.f32 %v163_v8, %v132_v16  ;;  %v1533_v7 = vmov 27   ;;  %v1534_v8 = vmov 26  }
  0x99   :  { %v169_v63 = vpop.permute.xlu1 %168  ;;  %v1720_v1 = vpop.permute.xlu0 %192  ;;  %v1537_v16 = vmov 29   ;;  %v1538_v17 = vmov 32  }
  0x9a   :  { %v171_v40 = vsel %vm170_vm4, %v167_v54, %v169_v63  ;;  %v172_v4 = vsel %vm170_vm4, %v169_v63, %v167_v54 }
  0x9b   :  { %v186_v53 = vmul.f32 %v1762_v23, %v171_v40  ;;  %v187_v54 = vmul.f32 %v1765_v24, %v172_v4 }
  0x9d   :  { %v200_v19 = vpop.permute.xlu1 %199  ;;  %v226_v20 = vpop.permute.xlu0 %225  ;;  %v196_v21 = vmul.f32 %v1720_v1, %v187_v54  ;;  %v1839_v54 = vsub.s32 4, %v1684_v47 }
  0xa1   :  { %v259_v34 = vpop.permute.xlu1 %258  ;;  %v202_v36 = vpop.permute.xlu0 %201 }
  0xa2   :  { %v204_v49 = vsel %vm203_vm5, %v200_v19, %v202_v36  ;;  %v205_v50 = vsel %vm203_vm5, %v202_v36, %v200_v19  ;;  %v195_v19 = vmul.f32 %v1720_v1, %v186_v53  ;;  %v198_v36 = vadd.f32 %v196_v21, %v165_v30 }
  0xa3   :  { %v219_v9 = vmul.f32 %v1769_v27, %v204_v49  ;;  %v220_v10 = vmul.f32 %v1782_v35, %v205_v50  ;;  %v1539_v21 = vmov 35   ;;  %v1541_v30 = vmov 33  }
  0xa4   :  { %v197_v33 = vadd.f32 %v195_v19, %v164_v29 }
  0xa5   :  { %v235_v58 = vpop.permute.xlu1 %234  ;;  %v233_v61 = vpop.permute.xlu0 %232  ;;  %v228_v31 = vmul.f32 %v226_v20, %v219_v9  ;;  %v229_v32 = vmul.f32 %v226_v20, %v220_v10  ;;  %v1535_v9 = vmov 28  }
  0xa6   :  { %v237_v63 = vsel %vm236_vm6, %v233_v61, %v235_v58  ;;  %v238_v6 = vsel %vm236_vm6, %v235_v58, %v233_v61 }
  0xa7   :  { %v252_v22 = vmul.f32 %v1805_v59, %v237_v63  ;;  %v253_v25 = vmul.f32 %v1808_v60, %v238_v6  ;;  %v230_v37 = vadd.f32 %v228_v31, %v197_v33  ;;  %v231_v41 = vadd.f32 %v229_v32, %v198_v36 }
  0xa8   :  { %v1531_v63 = vmov 24   ;;  %v1532_v6 = vmov 25  }
  0xa9   :  { %v292_v26 = vpop.permute.xlu0 %291  ;;  %v261_v1 = vmul.f32 %v259_v34, %v252_v22  ;;  %v262_v38 = vmul.f32 %v259_v34, %v253_v25  ;;  %v266_v39 = vpop.permute.xlu1 %265 }
  0xab   :  { %v263_v46 = vadd.f32 %v261_v1, %v230_v37  ;;  %v264_v20 = vadd.f32 %v262_v38, %v231_v41  ;;  %v1542_v1 = vmov 34   ;;  %v1376_v38 = vld [vmem:[%s2561_s5] sm:$0xff] }
  0xad   :  { %v268_v40 = vpop.permute.xlu0 %267  ;;  %v302_v53 = vpop.permute.xlu1 %301 }
  0xae   :  { %v270_v4 = vsel %vm269_vm7, %v266_v39, %v268_v40  ;;  %v271_v2 = vsel %vm269_vm7, %v268_v40, %v266_v39 }
  0xaf   :  { %v285_v42 = vmul.f32 %v1827_v55, %v270_v4  ;;  %v286_v44 = vmul.f32 %v1830_v28, %v271_v2 }
  0xb1   :  { %v294_v43 = vmul.f32 %v292_v26, %v285_v42  ;;  %v295_v49 = vmul.f32 %v292_v26, %v286_v44  ;;  %v1540_v26 = vmov 30   ;;  %v326_v32 = vpop.permute.xlu0 %325 }
  0xb2   :  { %v1875_v10 = vpop.permute.xlu1 %339 }
  0xb3   :  { %v296_v50 = vadd.f32 %v294_v43, %v263_v46  ;;  %v297_v34 = vadd.f32 %v295_v49, %v264_v20 }
  0xb5   :  { %v1841_v58 = vadd.f32 %v302_v53, %v296_v50  ;;  %v1843_v61 = vadd.f32 %v302_v53, %v297_v34 }
  0xb6   :  { %v1906_v33 = vpop.permute.xlu0 %355 }
  0xb7   :  { %308 = vrot.lane.b32.xlu1 %v1843_v61, %s1500_s25  ;;  %306 = vrot.lane.b32.xlu0 %v1841_v58, %s1500_s25  ;;  %v1882_v19 = vpop.permute.xlu1 %371 }
  0xbb   :  { %424 = vrot.lane.b32.xlu1 %v1841_v58, %s1501_s30  ;;  %426 = vrot.lane.b32.xlu0 %v1843_v61, %s1501_s30  ;;  %v1914_v39 = vpop.permute.xlu0 %457 }
  0xbc   :  { %v1888_v22 = vpop.permute.xlu1 %441 }
  0xbf   :  { %945 = vperm.xlu1 %1483, %v1655_v13   ;;  %544 = vrot.lane.b32.xlu0 %v1841_v58, %s1502_s9 }
  0xc0   :  { %v1919_v4 = vpop.permute.xlu0 %561 }
  0xc1   :  { %v1894_v25 = vpop.permute.xlu1 %473 }
  0xc3   :  { %1484 = vset.pattern.permute.xlu1 %v1530_v45  ;;  %929 = vperm.xlu0 %1482, %v1655_v13  }
  0xc4   :  { %961 = vperm.xlu1 %1484, %v1655_v13  }
  0xc5   :  { %v1923_v37 = vpop.permute.xlu0 %609 }
  0xc6   :  { %v1897_v29 = vpop.permute.xlu1 %489 }
  0xc7   :  { %1485 = vset.pattern.permute.xlu0 %v1531_v63  ;;  %v1948_v63 = vsub.s32 2, %v1684_v47 }
  0xc8   :  { %1486 = vset.pattern.permute.xlu1 %v1532_v6  ;;  %1033 = vperm.xlu0 %1485, %v1655_v13   ;;  %v1951_v6 = vsub.s32 3, %v1684_v47 }
  0xc9   :  { %1049 = vperm.xlu1 %1486, %v1655_v13  }
  0xcb   :  { %v1903_v31 = vpop.permute.xlu1 %577 }
  0xcc   :  { %898 = vrot.lane.b32.xlu0 %v1843_v61, %s1504_s14 }
  0xcd   :  { %546 = vrot.lane.b32.xlu1 %v1843_v61, %s1502_s9  ;;  %1488 = vset.pattern.permute.xlu0 %v1533_v7 }
  0xce   :  { %1487 = vset.pattern.permute.xlu1 %v1534_v8 }
  0xd0   :  { %1016 = vrot.lane.b32.xlu0 %v1841_v58, %s1505_s19  ;;  %v1908_v36 = vpop.permute.xlu1 %593 }
  0xd1   :  { %664 = vrot.lane.b32.xlu1 %v1841_v58, %s1503_s11 }
  0xd4   :  { %1081 = vperm.xlu0 %1488, %v1655_v13  }
  0xd5   :  { %666 = vrot.lane.b32.xlu1 %v1843_v61, %s1503_s11  ;;  %v1916_v40 = vpop.permute.xlu1 %697 }
  0xd8   :  { %1489 = vset.pattern.permute.xlu0 %v1535_v9 }
  0xd9   :  { %1065 = vperm.xlu1 %1487, %v1655_v13   ;;  %1153 = vperm.xlu0 %1489, %v1655_v13  }
  0xda   :  { %v1921_v2 = vpop.permute.xlu1 %713 }
  0xdd   :  { %896 = vrot.lane.b32.xlu1 %v1841_v58, %s1504_s14  ;;  %1492 = vset.pattern.permute.xlu0 %v1536_v15 }
  0xde   :  { %1490 = vset.pattern.permute.xlu1 %v1537_v16  ;;  %1201 = vperm.xlu0 %1492, %v1655_v13  }
  0xdf   :  { %v1925_v41 = vpop.permute.xlu1 %793 }
  0xe1   :  { %1018 = vrot.lane.b32.xlu1 %v1843_v61, %s1505_s19 }
  0xe2   :  { %1493 = vset.pattern.permute.xlu0 %v1538_v17  ;;  %v1967_v17 = vsub.s32 7, %v1684_v47 }
  0xe3   :  { %1273 = vperm.xlu0 %1493, %v1655_v13  }
  0xe4   :  { %v1929_v42 = vpop.permute.xlu1 %809 }
  0xe5   :  { %1136 = vrot.lane.b32.xlu1 %v1841_v58, %s1506_s22 }
  0xe7   :  { %1496 = vset.pattern.permute.xlu0 %v1539_v21 }
  0xe8   :  { %1321 = vperm.xlu0 %1496, %v1655_v13  }
  0xe9   :  { %1138 = vrot.lane.b32.xlu1 %v1843_v61, %s1506_s22  ;;  %v1933_v46 = vpop.permute.xlu1 %841 }
  0xec   :  { %1498 = vset.pattern.permute.xlu0 %v1499_v0 }
  0xed   :  { %1169 = vperm.xlu1 %1490, %v1655_v13  }
  0xee   :  { %v1935_v20 = vpop.permute.xlu1 %913 }
  0xef   :  { %2581 = vst [vmem:[#allocation10_spill] sm:$0xff] %v1935_v20 }
  0xf1   :  { %1491 = vset.pattern.permute.xlu1 %v1540_v26 }
  0xf2   :  { %1185 = vperm.xlu1 %1491, %v1655_v13  }
  0xf6   :  { %1256 = vrot.lane.b32.xlu1 %v1841_v58, %s1507_s26 }
  0xf7   :  { %1494 = vset.pattern.permute.xlu1 %v1541_v30 }
  0xfa   :  { %1258 = vrot.lane.b32.xlu1 %v1843_v61, %s1507_s26 }
  0xfe   :  { %1289 = vperm.xlu1 %1494, %v1655_v13  }
 0x102   :  { %1495 = vset.pattern.permute.xlu1 %v1542_v1 }
 0x103   :  { %1305 = vperm.xlu1 %1495, %v1655_v13   ;;  %v1927_v13 = vpop.permute.xlu0 %681 }
 0x107   :  { %1497 = vset.pattern.permute.xlu1 %v1499_v0  ;;  %v1931_v44 = vpop.permute.xlu0 %729 }
 0x108   :  { %1379 = vperm.xlu1 %1497, %v1376_v38   ;;  %2580 = vst [vmem:[#allocation9_spill] sm:$0xff] %v1931_v44 }
 0x10b   :  { %v1937_v0 = vpop.permute.xlu0 %825 }
 0x129   :  { %v309_v43 = vpop.permute.xlu1 %308  ;;  %v307_v49 = vpop.permute.xlu0 %306 }
 0x12a   :  { %v310_v50 = vsel %vm40_vm0, %v307_v49, %v309_v43  ;;  %v311_v34 = vsel %vm40_vm0, %v309_v43, %v307_v49 }
 0x12b   :  { %v312_v53 = vmul.f32 %v311_v34, %v1701_v56  ;;  %v1945_v45 = vmul.f32 %v310_v50, %v1704_v57  ;;  %v1960_v56 = vsub.s32 6, %v1684_v47  ;;  %v1963_v57 = vsub.s32 5, %v1684_v47 }
 0x12d   :  { %v318_v7 = vrot.slane %v312_v53, %v1689_v51  ;;  %v322_v8 = vrot.slane %v1945_v45, %v1689_v51  ;;  %v333_v9 = vrot.slane %v312_v53, %v1692_v52  ;;  %v337_v15 = vrot.slane %v1945_v45, %v1692_v52  ;;  %v425_v28 = vpop.permute.xlu1 %424  ;;  %v427_v55 = vpop.permute.xlu0 %426 }
 0x12e   :  { %v349_v16 = vrot.slane %v312_v53, %v1948_v63  ;;  %v365_v30 = vrot.slane %v312_v53, %v1951_v6  ;;  %v353_v49 = vrot.slane %v1945_v45, %v1948_v63  ;;  %v381_v47 = vrot.slane %v312_v53, %v1839_v54 }
 0x12f   :  { %v328_v21 = vmul.f32 %v326_v32, %v318_v7  ;;  %v342_v26 = vmul.f32 %v1875_v10, %v333_v9  ;;  %v329_v38 = vmul.f32 %v326_v32, %v322_v8  ;;  %v343_v43 = vmul.f32 %v1875_v10, %v337_v15 }
 0x130   :  { %v358_v34 = vmul.f32 %v1906_v33, %v349_v16  ;;  %v385_v7 = vrot.slane %v1945_v45, %v1839_v54  ;;  %v391_v9 = vrot.slane %v312_v53, %v1963_v57  ;;  %v395_v62 = vrot.slane %v1945_v45, %v1963_v57 }
 0x131   :  { %v344_v50 = vadd.f32 %v342_v26, %v328_v21  ;;  %v403_v8 = vrot.slane %v312_v53, %v1960_v56  ;;  %v407_v15 = vrot.slane %v1945_v45, %v1960_v56  ;;  %v374_v21 = vmul.f32 %v1882_v19, %v365_v30 }
 0x132   :  { %v386_v26 = vmul.f32 %v381_v47, %v326_v32  ;;  %v387_v16 = vmul.f32 %v385_v7, %v326_v32  ;;  %v345_v60 = vadd.f32 %v343_v43, %v329_v38  ;;  %v396_v59 = vmul.f32 %v391_v9, %v1875_v10 }
 0x133   :  { %v360_v1 = vadd.f32 %v358_v34, %v344_v50  ;;  %v397_v20 = vmul.f32 %v395_v62, %v1875_v10  ;;  %v408_v35 = vmul.f32 %v403_v8, %v1906_v33  ;;  %v409_v44 = vmul.f32 %v407_v15, %v1906_v33 }
 0x134   :  { %v415_v24 = vrot.slane %v312_v53, %v1967_v17  ;;  %v419_v50 = vrot.slane %v1945_v45, %v1967_v17  ;;  %v398_v30 = vadd.f32 %v396_v59, %v386_v26  ;;  %v428_v32 = vsel %vm71_vm1, %v425_v28, %v427_v55 }
 0x135   :  { %v376_v27 = vadd.f32 %v374_v21, %v360_v1  ;;  %v399_v34 = vadd.f32 %v397_v20, %v387_v16  ;;  %v429_v38 = vsel %vm71_vm1, %v427_v55, %v425_v28  ;;  %v359_v62 = vmul.f32 %v1906_v33, %v353_v49 }
 0x136   :  { %v369_v10 = vrot.slane %v1945_v45, %v1951_v6  ;;  %v2002_v1 = vmul.f32 %v429_v38, %v1723_v3  ;;  %v2005_v53 = vmul.f32 %v428_v32, %v1726_v5  ;;  %v410_v43 = vadd.f32 %v408_v35, %v398_v30 }
 0x137   :  { %v411_v59 = vadd.f32 %v409_v44, %v399_v34  ;;  %v420_v20 = vmul.f32 %v415_v24, %v1882_v19  ;;  %v421_v47 = vmul.f32 %v419_v50, %v1882_v19  ;;  %v879_v55 = vrot.slane %v1843_v61, %v1960_v56 }
 0x138   :  { %v819_v28 = vrot.slane %v1841_v58, %v1948_v63  ;;  %v875_v33 = vrot.slane %v1841_v58, %v1960_v56  ;;  %v361_v3 = vadd.f32 %v359_v62, %v345_v60  ;;  %v787_v5 = vrot.slane %v1841_v58, %v1689_v51 }
 0x139   :  { %v422_v45 = vadd.f32 %v420_v20, %v410_v43  ;;  %v423_v35 = vadd.f32 %v421_v47, %v411_v59  ;;  %v435_v24 = vrot.slane %v2002_v1, %v1689_v51  ;;  %v791_v49 = vrot.slane %v1843_v61, %v1689_v51 }
 0x13a   :  { %v2019_v44 = vpop.permute.xlu1 %945  ;;  %v855_v7 = vrot.slane %v1843_v61, %v1839_v54  ;;  %v375_v9 = vmul.f32 %v1882_v19, %v369_v10  ;;  %v439_v60 = vrot.slane %v2005_v53, %v1689_v51  ;;  %v803_v8 = vrot.slane %v1841_v58, %v1692_v52 }
 0x13b   :  { %v807_v15 = vrot.slane %v1843_v61, %v1692_v52  ;;  %v499_v19 = vrot.slane %v2002_v1, %v1839_v54  ;;  %v503_v30 = vrot.slane %v2005_v53, %v1839_v54  ;;  %v444_v32 = vmul.f32 %v1888_v22, %v435_v24 }
 0x13c   :  { %v377_v50 = vadd.f32 %v375_v9, %v361_v3  ;;  %v451_v38 = vrot.slane %v2002_v1, %v1692_v52  ;;  %v511_v62 = vrot.slane %v2002_v1, %v1963_v57  ;;  %v445_v10 = vmul.f32 %v1888_v22, %v439_v60 }
 0x13d   :  { %v455_v43 = vrot.slane %v2005_v53, %v1692_v52  ;;  %v504_v59 = vmul.f32 %v499_v19, %v1888_v22  ;;  %v505_v20 = vmul.f32 %v503_v30, %v1888_v22  ;;  %v446_v24 = vadd.f32 %v444_v32, %v376_v27 }
 0x13e   :  { %v515_v9 = vrot.slane %v2005_v53, %v1963_v57  ;;  %v523_v34 = vrot.slane %v2002_v1, %v1960_v56  ;;  %v447_v60 = vadd.f32 %v445_v10, %v377_v50  ;;  %v516_v21 = vmul.f32 %v511_v62, %v1914_v39 }
 0x13f   :  { %v2054_v47 = vpop.permute.xlu1 %961  ;;  %v506_v16 = vadd.f32 %v504_v59, %v422_v45  ;;  %v507_v26 = vadd.f32 %v505_v20, %v423_v35  ;;  %v2064_v19 = vmul.f32 %v1937_v0, %v819_v28  ;;  %v467_v27 = vrot.slane %v2002_v1, %v1948_v63 }
 0x140   :  { %v471_v30 = vrot.slane %v2005_v53, %v1948_v63  ;;  %v460_v32 = vmul.f32 %v1914_v39, %v451_v38  ;;  %v461_v50 = vmul.f32 %v1914_v39, %v455_v43  ;;  %v528_v35 = vmul.f32 %v523_v34, %v1894_v25 }
 0x141   :  { %2582 = vst [vmem:[#allocation11_spill] sm:$0xff] %v2064_v19  ;;  %v518_v45 = vadd.f32 %v516_v21, %v506_v16  ;;  %v2583_v28 = vrot.slane %v1843_v61, %v1948_v63  ;;  %v2082_v10 = vmul.f32 %v875_v33, %v1937_v0  ;;  %v517_v59 = vmul.f32 %v515_v9, %v1914_v39 }
 0x142   :  { %v527_v20 = vrot.slane %v2005_v53, %v1960_v56  ;;  %v2090_v21 = vmul.f32 %v879_v55, %v1937_v0  ;;  %v462_v16 = vadd.f32 %v460_v32, %v446_v24  ;;  %v463_v34 = vadd.f32 %v461_v50, %v447_v60 }
 0x143   :  { %v2079_v62 = vmul.f32 %v1937_v0, %v2583_v28  ;;  %2584 = vst [vmem:[#allocation12_spill] sm:$0xff] %v2082_v10  ;;  %v530_v43 = vadd.f32 %v528_v35, %v518_v45  ;;  %v2093_v22 = vmul.f32 %v1925_v41, %v787_v5  ;;  %v476_v28 = vmul.f32 %v1894_v25, %v467_v27 }
 0x144   :  { %v2087_v38 = vpop.permute.xlu1 %1049  ;;  %v477_v33 = vmul.f32 %v1894_v25, %v471_v30  ;;  %v519_v3 = vadd.f32 %v517_v59, %v507_v26  ;;  %v483_v39 = vrot.slane %v2002_v1, %v1951_v6  ;;  %v487_v9 = vrot.slane %v2005_v53, %v1951_v6  ;;  %v545_v30 = vpop.permute.xlu0 %544 }
 0x145   :  { %2585 = vst [vmem:[#allocation13_spill] sm:$0xff] %v2093_v22  ;;  %v535_v0 = vrot.slane %v2002_v1, %v1967_v17  ;;  %v539_v55 = vrot.slane %v2005_v53, %v1967_v17  ;;  %v2106_v5 = vmul.f32 %v1925_v41, %v791_v49  ;;  %v2586_v24 = vrot.slane %v1841_v58, %v1839_v54 }
 0x146   :  { %v2115_v60 = vmul.f32 %v855_v7, %v1925_v41  ;;  %v529_v27 = vmul.f32 %v527_v20, %v1894_v25  ;;  %v478_v1 = vadd.f32 %v476_v28, %v462_v16  ;;  %v479_v50 = vadd.f32 %v477_v33, %v463_v34 }
 0x147   :  { %v2112_v26 = vmul.f32 %v2586_v24, %v1925_v41  ;;  %v2123_v45 = vmul.f32 %v1929_v42, %v803_v8  ;;  %v492_v25 = vmul.f32 %v1897_v29, %v483_v39  ;;  %v493_v7 = vmul.f32 %v1897_v29, %v487_v9 }
 0x148   :  { %v547_v32 = vpop.permute.xlu1 %546  ;;  %v531_v35 = vadd.f32 %v529_v27, %v519_v3  ;;  %v540_v20 = vmul.f32 %v535_v0, %v1897_v29  ;;  %v541_v16 = vmul.f32 %v539_v55, %v1897_v29  ;;  %v2147_v28 = vmul.f32 %v1929_v42, %v807_v15 }
 0x149   :  { %2587 = vst [vmem:[#allocation14_spill] sm:$0xff] %v2112_v26  ;;  %v548_v53 = vsel %vm104_vm2, %v545_v30, %v547_v32  ;;  %v549_v49 = vsel %vm104_vm2, %v547_v32, %v545_v30  ;;  %2588 = vst [vmem:[#allocation15_spill] sm:$0xff] %v2123_v45  ;;  %v2589_v29 = vrot.slane %v1841_v58, %v1963_v57  ;;  %v2157_v30 = vpop.permute.xlu0 %929 }
 0x14a   :  { %v2126_v59 = vmul.f32 %v549_v49, %v1739_v11  ;;  %v2129_v41 = vmul.f32 %v548_v53, %v1742_v12  ;;  %v494_v39 = vadd.f32 %v492_v25, %v478_v1  ;;  %v495_v9 = vadd.f32 %v493_v7, %v479_v50 }
 0x14b   :  { %v2153_v33 = vmul.f32 %v2589_v29, %v1929_v42  ;;  %v542_v0 = vadd.f32 %v540_v20, %v530_v43  ;;  %v543_v55 = vadd.f32 %v541_v16, %v531_v35 }
 0x14c   :  { %v555_v34 = vrot.slane %v2126_v59, %v1689_v51  ;;  %v559_v8 = vrot.slane %v2129_v41, %v1689_v51  ;;  %v571_v11 = vrot.slane %v2126_v59, %v1692_v52  ;;  %v575_v12 = vrot.slane %v2129_v41, %v1692_v52  ;;  %v665_v3 = vpop.permute.xlu1 %664 }
 0x14d   :  { %2590 = vst [vmem:[#allocation16_spill] sm:$0xff] %v2153_v33  ;;  %v587_v53 = vrot.slane %v2126_v59, %v1948_v63  ;;  %v591_v49 = vrot.slane %v2129_v41, %v1948_v63  ;;  %v619_v43 = vrot.slane %v2126_v59, %v1839_v54  ;;  %v623_v35 = vrot.slane %v2129_v41, %v1839_v54  ;;  %v2189_v22 = vpop.permute.xlu0 %1033 }
 0x14e   :  { %v564_v24 = vmul.f32 %v1919_v4, %v555_v34  ;;  %v565_v27 = vmul.f32 %v1919_v4, %v559_v8  ;;  %v580_v32 = vmul.f32 %v1903_v31, %v571_v11  ;;  %v581_v15 = vmul.f32 %v1903_v31, %v575_v12 }
 0x14f   :  { %v631_v7 = vrot.slane %v2126_v59, %v1963_v57  ;;  %v635_v20 = vrot.slane %v2129_v41, %v1963_v57  ;;  %v643_v16 = vrot.slane %v2126_v59, %v1960_v56  ;;  %v647_v34 = vrot.slane %v2129_v41, %v1960_v56 }
 0x150   :  { %v566_v1 = vadd.f32 %v564_v24, %v494_v39  ;;  %v567_v50 = vadd.f32 %v565_v27, %v495_v9  ;;  %v667_v25 = vpop.permute.xlu1 %666  ;;  %v603_v8 = vrot.slane %v2126_v59, %v1951_v6  ;;  %v607_v11 = vrot.slane %v2129_v41, %v1951_v6 }
 0x151   :  { %v624_v12 = vmul.f32 %v619_v43, %v1919_v4  ;;  %v625_v29 = vmul.f32 %v623_v35, %v1919_v4  ;;  %v596_v24 = vmul.f32 %v1908_v36, %v587_v53  ;;  %v597_v27 = vmul.f32 %v1908_v36, %v591_v49 }
 0x152   :  { %v582_v39 = vadd.f32 %v580_v32, %v566_v1  ;;  %v583_v9 = vadd.f32 %v581_v15, %v567_v50  ;;  %v636_v33 = vmul.f32 %v631_v7, %v1903_v31  ;;  %v637_v45 = vmul.f32 %v635_v20, %v1903_v31 }
 0x153   :  { %v626_v10 = vadd.f32 %v624_v12, %v542_v0  ;;  %v627_v19 = vadd.f32 %v625_v29, %v543_v55  ;;  %v648_v43 = vmul.f32 %v643_v16, %v1908_v36  ;;  %v649_v4 = vmul.f32 %v647_v34, %v1908_v36  ;;  %v899_v29 = vpop.permute.xlu0 %898 }
 0x154   :  { %v2187_v26 = vpop.permute.xlu1 %1065  ;;  %v668_v32 = vsel %vm137_vm3, %v665_v3, %v667_v25  ;;  %v669_v15 = vsel %vm137_vm3, %v667_v25, %v665_v3  ;;  %v655_v53 = vrot.slane %v2126_v59, %v1967_v17  ;;  %v659_v31 = vrot.slane %v2129_v41, %v1967_v17 }
 0x155   :  { %2591 = vst [vmem:[#allocation17_spill] sm:$0xff] %v2187_v26  ;;  %v638_v0 = vadd.f32 %v636_v33, %v626_v10  ;;  %v639_v55 = vadd.f32 %v637_v45, %v627_v19  ;;  %v598_v49 = vadd.f32 %v596_v24, %v582_v39  ;;  %v599_v1 = vadd.f32 %v597_v27, %v583_v9  ;;  %v2598_v26 = vld [vmem:[#allocation2_spill] sm:$0xff] }
 0x156   :  { %v2202_v50 = vmul.f32 %v669_v15, %v1746_v14  ;;  %v2205_v36 = vmul.f32 %v668_v32, %v1756_v18  ;;  %v2592_v3 = vrot.slane %v1843_v61, %v1963_v57  ;;  %v2593_v19 = vrot.slane %v1841_v58, %v1951_v6 }
 0x157   :  { %v650_v59 = vadd.f32 %v648_v43, %v638_v0  ;;  %v651_v41 = vadd.f32 %v649_v4, %v639_v55  ;;  %v612_v14 = vmul.f32 %v1923_v37, %v603_v8  ;;  %v613_v33 = vmul.f32 %v1923_v37, %v607_v11 }
 0x158   :  { %v2211_v10 = vmul.f32 %v2592_v3, %v1929_v42  ;;  %v2217_v45 = vmul.f32 %v1933_v46, %v2593_v19  ;;  %v675_v18 = vrot.slane %v2202_v50, %v1689_v51  ;;  %v679_v35 = vrot.slane %v2205_v36, %v1689_v51  ;;  %v897_v42 = vpop.permute.xlu1 %896 }
 0x159   :  { %v660_v25 = vmul.f32 %v655_v53, %v1923_v37  ;;  %v661_v7 = vmul.f32 %v659_v31, %v1923_v37  ;;  %v691_v20 = vrot.slane %v2202_v50, %v1692_v52  ;;  %v695_v16 = vrot.slane %v2205_v36, %v1692_v52 }
 0x15a   :  { %2594 = vst [vmem:[#allocation18_spill] sm:$0xff] %v2217_v45  ;;  %v2595_v34 = vrot.slane %v1843_v61, %v1951_v6  ;;  %v2596_v11 = vrot.slane %v1841_v58, %v1967_v17  ;;  %v614_v37 = vadd.f32 %v612_v14, %v598_v49  ;;  %v615_v39 = vadd.f32 %v613_v33, %v599_v1 }
 0x15b   :  { %v662_v9 = vadd.f32 %v660_v25, %v650_v59  ;;  %v663_v24 = vadd.f32 %v661_v7, %v651_v41  ;;  %v739_v27 = vrot.slane %v2202_v50, %v1839_v54  ;;  %v743_v43 = vrot.slane %v2205_v36, %v1839_v54 }
 0x15c   :  { %v2235_v8 = vmul.f32 %v1933_v46, %v2595_v34  ;;  %v2241_v12 = vmul.f32 %v2596_v11, %v1933_v46  ;;  %v684_v4 = vmul.f32 %v1927_v13, %v675_v18  ;;  %v685_v32 = vmul.f32 %v1927_v13, %v679_v35  ;;  %v1019_v59 = vpop.permute.xlu1 %1018  ;;  %v1017_v35 = vpop.permute.xlu0 %1016 }
 0x15d   :  { %v707_v58 = vrot.slane %v2202_v50, %v1948_v63  ;;  %v711_v15 = vrot.slane %v2205_v36, %v1948_v63  ;;  %v700_v0 = vmul.f32 %v1916_v40, %v691_v20  ;;  %v701_v55 = vmul.f32 %v1916_v40, %v695_v16 }
 0x15e   :  { %2597 = vst [vmem:[#allocation19_spill] sm:$0xff] %v2241_v12  ;;  %v723_v53 = vrot.slane %v2202_v50, %v1951_v6  ;;  %v755_v31 = vrot.slane %v2205_v36, %v1963_v57  ;;  %v727_v49 = vrot.slane %v2205_v36, %v1951_v6  ;;  %v744_v1 = vmul.f32 %v739_v27, %v1927_v13 }
 0x15f   :  { %v745_v3 = vmul.f32 %v743_v43, %v1927_v13  ;;  %v900_v19 = vsel %vm170_vm4, %v897_v42, %v899_v29  ;;  %v751_v41 = vrot.slane %v2202_v50, %v1963_v57  ;;  %v763_v14 = vrot.slane %v2202_v50, %v1960_v56 }
 0x160   :  { %v767_v33 = vrot.slane %v2205_v36, %v1960_v56  ;;  %v775_v18 = vrot.slane %v2202_v50, %v1967_v17  ;;  %v779_v13 = vrot.slane %v2205_v36, %v1967_v17  ;;  %v901_v25 = vsel %vm170_vm4, %v899_v29, %v897_v42 }
 0x161   :  { %v686_v7 = vadd.f32 %v684_v4, %v614_v37  ;;  %v687_v20 = vadd.f32 %v685_v32, %v615_v39  ;;  %v757_v16 = vmul.f32 %v755_v31, %v1916_v40  ;;  %v2279_v34 = vmul.f32 %v900_v19, %v1762_v23  ;;  %v2291_v37 = vpop.permute.xlu1 %1136  ;;  %v2599_v4 = vld [vmem:[#allocation9_spill] sm:$0xff] }
 0x162   :  { %v1020_v11 = vsel %vm203_vm5, %v1017_v35, %v1019_v59  ;;  %v717_v27 = vmul.f32 %v1921_v2, %v711_v15  ;;  %v746_v12 = vadd.f32 %v744_v1, %v662_v9  ;;  %v747_v45 = vadd.f32 %v745_v3, %v663_v24 }
 0x163   :  { %v702_v50 = vadd.f32 %v700_v0, %v686_v7  ;;  %v703_v43 = vadd.f32 %v701_v55, %v687_v20  ;;  %v756_v36 = vmul.f32 %v751_v41, %v1916_v40  ;;  %v2286_v42 = vmul.f32 %v901_v25, %v2598_v26  ;;  %v2601_v26 = vld [vmem:[#allocation3_spill] sm:$0xff] }
 0x164   :  { %v1021_v29 = vsel %vm203_vm5, %v1019_v59, %v1017_v35  ;;  %v716_v23 = vmul.f32 %v1921_v2, %v707_v58  ;;  %v733_v32 = vmul.f32 %v2599_v4, %v727_v49  ;;  %v759_v15 = vadd.f32 %v757_v16, %v747_v45  ;;  %v2602_v45 = vld [vmem:[#allocation4_spill] sm:$0xff] }
 0x165   :  { %v719_v39 = vadd.f32 %v717_v27, %v703_v43  ;;  %v769_v0 = vmul.f32 %v767_v33, %v1921_v2  ;;  %v2600_v40 = vrot.slane %v1843_v61, %v1967_v17  ;;  %v2300_v24 = vmul.f32 %v1020_v11, %v2601_v26  ;;  %v2329_v16 = vpop.permute.xlu1 %1138 }
 0x166   :  { %v718_v55 = vadd.f32 %v716_v23, %v702_v50  ;;  %v758_v31 = vadd.f32 %v756_v36, %v746_v12  ;;  %v781_v3 = vmul.f32 %v779_v13, %v2599_v4  ;;  %v907_v49 = vrot.slane %v2279_v34, %v1689_v51 }
 0x167   :  { %v893_v9 = vmul.f32 %v2600_v40, %v1933_v46  ;;  %v735_v1 = vadd.f32 %v733_v32, %v719_v39  ;;  %v771_v58 = vadd.f32 %v769_v0, %v759_v15  ;;  %v2306_v19 = vmul.f32 %v1021_v29, %v2602_v45 }
 0x168   :  { %v732_v59 = vmul.f32 %v2599_v4, %v723_v53  ;;  %v768_v61 = vmul.f32 %v763_v14, %v1921_v2  ;;  %v911_v46 = vrot.slane %v2286_v42, %v1689_v51  ;;  %v780_v41 = vmul.f32 %v775_v18, %v2599_v4  ;;  %v2603_v18 = vld [vmem:[#allocation10_spill] sm:$0xff] }
 0x169   :  { %v783_v12 = vadd.f32 %v781_v3, %v771_v58  ;;  %v799_v33 = vadd.f32 %v2106_v5, %v735_v1  ;;  %v923_v35 = vrot.slane %v2279_v34, %v1692_v52  ;;  %v927_v7 = vrot.slane %v2286_v42, %v1692_v52  ;;  %v2368_v3 = vpop.permute.xlu1 %1169 }
 0x16a   :  { %v2316_v13 = vadd.f32 %v732_v59, %v718_v55  ;;  %v770_v25 = vadd.f32 %v768_v61, %v758_v31  ;;  %v939_v2 = vrot.slane %v2279_v34, %v1948_v63  ;;  %v2325_v20 = vmul.f32 %v2603_v18, %v907_v49 }
 0x16b   :  { %v815_v53 = vadd.f32 %v2147_v28, %v799_v33  ;;  %v859_v14 = vadd.f32 %v2115_v60, %v783_v12  ;;  %v943_v5 = vrot.slane %v2286_v42, %v1948_v63  ;;  %v917_v11 = vmul.f32 %v2603_v18, %v911_v46 }
 0x16c   :  { %v955_v27 = vrot.slane %v2279_v34, %v1951_v6  ;;  %v959_v50 = vrot.slane %v2286_v42, %v1951_v6  ;;  %v971_v28 = vrot.slane %v2279_v34, %v1839_v54  ;;  %v2341_v36 = vmul.f32 %v2157_v30, %v923_v35 }
 0x16d   :  { %v831_v60 = vadd.f32 %v2079_v62, %v815_v53  ;;  %v871_v43 = vadd.f32 %v2211_v10, %v859_v14  ;;  %v975_v29 = vrot.slane %v2286_v42, %v1839_v54  ;;  %v782_v23 = vadd.f32 %v780_v41, %v770_v25 }
 0x16e   :  { %v933_v39 = vmul.f32 %v2157_v30, %v927_v7  ;;  %v2347_v4 = vmul.f32 %v2019_v44, %v939_v2  ;;  %v983_v32 = vrot.slane %v2279_v34, %v1963_v57  ;;  %v949_v10 = vmul.f32 %v2019_v44, %v943_v5 }
 0x16f   :  { %v847_v15 = vadd.f32 %v2235_v8, %v831_v60  ;;  %v883_v62 = vadd.f32 %v2090_v21, %v871_v43  ;;  %v987_v0 = vrot.slane %v2286_v42, %v1963_v57  ;;  %v2357_v40 = vmul.f32 %v2054_v47, %v955_v27  ;;  %v2604_v43 = vld [vmem:[#allocation17_spill] sm:$0xff] }
 0x170   :  { %v965_v26 = vmul.f32 %v2054_v47, %v959_v50  ;;  %v2361_v55 = vmul.f32 %v971_v28, %v2603_v18  ;;  %v995_v31 = vrot.slane %v2279_v34, %v1960_v56  ;;  %v977_v21 = vmul.f32 %v975_v29, %v2603_v18  ;;  %v2406_v28 = vpop.permute.xlu1 %1185 }
 0x171   :  { %v895_v1 = vadd.f32 %v893_v9, %v883_v62  ;;  %v919_v8 = vadd.f32 %v917_v11, %v847_v15  ;;  %v999_v58 = vrot.slane %v2286_v42, %v1960_v56  ;;  %v2371_v49 = vmul.f32 %v983_v32, %v2157_v30 }
 0x172   :  { %v1007_v45 = vrot.slane %v2279_v34, %v1967_v17  ;;  %v1011_v59 = vrot.slane %v2286_v42, %v1967_v17  ;;  %v1027_v9 = vrot.slane %v2300_v24, %v1689_v51  ;;  %v989_v41 = vmul.f32 %v987_v0, %v2157_v30 }
 0x173   :  { %v935_v61 = vadd.f32 %v933_v39, %v919_v8  ;;  %v979_v46 = vadd.f32 %v977_v21, %v895_v1  ;;  %v1031_v12 = vrot.slane %v2306_v19, %v1689_v51  ;;  %v2383_v33 = vmul.f32 %v995_v31, %v2019_v44  ;;  %v2605_v1 = vld [vmem:[#allocation13_spill] sm:$0xff] }
 0x174   :  { %v1043_v35 = vrot.slane %v2300_v24, %v1692_v52  ;;  %v1047_v34 = vrot.slane %v2306_v19, %v1692_v52  ;;  %v1059_v42 = vrot.slane %v2300_v24, %v1948_v63  ;;  %v1001_v2 = vmul.f32 %v999_v58, %v2019_v44 }
 0x175   :  { %v951_v25 = vadd.f32 %v949_v10, %v935_v61  ;;  %v991_v7 = vadd.f32 %v989_v41, %v979_v46  ;;  %v1063_v30 = vrot.slane %v2306_v19, %v1948_v63  ;;  %v2395_v53 = vmul.f32 %v1007_v45, %v2054_v47 }
 0x176   :  { %v1013_v14 = vmul.f32 %v1011_v59, %v2054_v47  ;;  %v2399_v18 = vmul.f32 %v2189_v22, %v1027_v9  ;;  %v1095_v5 = vrot.slane %v2306_v19, %v1839_v54  ;;  %v1037_v50 = vmul.f32 %v2189_v22, %v1031_v12  ;;  %v1082_v59 = vpop.permute.xlu0 %1081  ;;  %v2606_v9 = vld [vmem:[#allocation14_spill] sm:$0xff] }
 0x177   :  { %v967_v11 = vadd.f32 %v965_v26, %v951_v25  ;;  %v1003_v27 = vadd.f32 %v1001_v2, %v991_v7  ;;  %v1107_v44 = vrot.slane %v2306_v19, %v1963_v57  ;;  %v2409_v60 = vmul.f32 %v2087_v38, %v1043_v35  ;;  %v2607_v35 = vld [vmem:[#allocation15_spill] sm:$0xff]  ;;  %v2608_v25 = vld [vmem:[#allocation16_spill] sm:$0xff] }
 0x178   :  { %v1053_v47 = vmul.f32 %v2087_v38, %v1047_v34  ;;  %v2413_v29 = vmul.f32 %v2604_v43, %v1059_v42  ;;  %v1119_v39 = vrot.slane %v2306_v19, %v1960_v56  ;;  %v1069_v62 = vmul.f32 %v2604_v43, %v1063_v30  ;;  %v2609_v2 = vld [vmem:[#allocation11_spill] sm:$0xff] }
 0x179   :  { %v1015_v32 = vadd.f32 %v1013_v14, %v1003_v27  ;;  %v1039_v15 = vadd.f32 %v1037_v50, %v967_v11  ;;  %v1097_v10 = vmul.f32 %v1095_v5, %v2189_v22  ;;  %v1075_v0 = vrot.slane %v2300_v24, %v1951_v6  ;;  %v2610_v11 = vld [vmem:[#allocation5_spill] sm:$0xff] }
 0x17a   :  { %v1079_v26 = vrot.slane %v2306_v19, %v1951_v6  ;;  %v1109_v31 = vmul.f32 %v1107_v44, %v2087_v38  ;;  %v798_v8 = vadd.f32 %v2605_v1, %v2316_v13  ;;  %v1131_v45 = vrot.slane %v2306_v19, %v1967_v17  ;;  %v2611_v44 = vld [vmem:[#allocation12_spill] sm:$0xff] }
 0x17b   :  { %v1055_v21 = vadd.f32 %v1053_v47, %v1039_v15  ;;  %v1099_v58 = vadd.f32 %v1097_v10, %v1015_v32  ;;  %v858_v61 = vadd.f32 %v2606_v9, %v782_v23  ;;  %v1091_v46 = vrot.slane %v2300_v24, %v1839_v54  ;;  %v1257_v23 = vpop.permute.xlu1 %1256  ;;  %v2612_v32 = vld [vmem:[#allocation6_spill] sm:$0xff] }
 0x17c   :  { %v1103_v41 = vrot.slane %v2300_v24, %v1963_v57  ;;  %v1121_v12 = vmul.f32 %v1119_v39, %v2604_v43  ;;  %v814_v34 = vadd.f32 %v2607_v35, %v798_v8  ;;  %v1140_v19 = vsel %vm236_vm6, %v2291_v37, %v2329_v16  ;;  %v2614_v8 = vld [vmem:[#allocation19_spill] sm:$0xff] }
 0x17d   :  { %v1071_v42 = vadd.f32 %v1069_v62, %v1055_v21  ;;  %v1111_v13 = vadd.f32 %v1109_v31, %v1099_v58  ;;  %v870_v7 = vadd.f32 %v2608_v25, %v858_v61  ;;  %v1085_v14 = vmul.f32 %v1082_v59, %v1079_v26  ;;  %v2613_v26 = vld [vmem:[#allocation18_spill] sm:$0xff] }
 0x17e   :  { %v830_v30 = vadd.f32 %v2609_v2, %v814_v34  ;;  %v1141_v5 = vsel %vm236_vm6, %v2329_v16, %v2291_v37  ;;  %v2446_v27 = vmul.f32 %v1140_v19, %v2610_v11  ;;  %v1133_v39 = vmul.f32 %v1131_v45, %v1082_v59 }
 0x17f   :  { %v1123_v50 = vadd.f32 %v1121_v12, %v1111_v13  ;;  %v882_v47 = vadd.f32 %v2611_v44, %v870_v7  ;;  %v1143_v15 = vmul.f32 %v1141_v5, %v2612_v32  ;;  %v1096_v62 = vmul.f32 %v1091_v46, %v2189_v22  ;;  %v1154_v46 = vpop.permute.xlu0 %1153  ;;  %v1259_v13 = vpop.permute.xlu1 %1258 }
 0x180   :  { %v1115_v10 = vrot.slane %v2300_v24, %v1960_v56  ;;  %v846_v31 = vadd.f32 %v2613_v26, %v830_v30  ;;  %v1087_v1 = vadd.f32 %v1085_v14, %v1071_v42  ;;  %v1108_v9 = vmul.f32 %v1103_v41, %v2087_v38 }
 0x181   :  { %v894_v21 = vadd.f32 %v2614_v8, %v882_v47  ;;  %v1135_v37 = vadd.f32 %v1133_v39, %v1123_v50  ;;  %v1151_v16 = vrot.slane %v1143_v15, %v1689_v51  ;;  %v1215_v58 = vrot.slane %v1143_v15, %v1839_v54 }
 0x182   :  { %v1127_v45 = vrot.slane %v2300_v24, %v1967_v17  ;;  %v918_v22 = vadd.f32 %v2325_v20, %v846_v31  ;;  %v1147_v61 = vrot.slane %v2446_v27, %v1689_v51  ;;  %v1167_v42 = vrot.slane %v1143_v15, %v1692_v52 }
 0x183   :  { %v978_v12 = vadd.f32 %v2361_v55, %v894_v21  ;;  %v1157_v35 = vmul.f32 %v1154_v46, %v1151_v16  ;;  %v1217_v34 = vmul.f32 %v1215_v58, %v1154_v46  ;;  %v1211_v38 = vrot.slane %v2446_v27, %v1839_v54  ;;  %v1202_v26 = vpop.permute.xlu0 %1201 }
 0x184   :  { %v934_v25 = vadd.f32 %v2341_v36, %v918_v22  ;;  %v1163_v24 = vrot.slane %v2446_v27, %v1692_v52  ;;  %v1227_v20 = vrot.slane %v1143_v15, %v1963_v57  ;;  %v1120_v41 = vmul.f32 %v1115_v10, %v2604_v43 }
 0x185   :  { %v990_v7 = vadd.f32 %v2371_v49, %v978_v12  ;;  %v1159_v55 = vadd.f32 %v1157_v35, %v1087_v1  ;;  %v1219_v19 = vadd.f32 %v1217_v34, %v1135_v37  ;;  %v1084_v30 = vmul.f32 %v1082_v59, %v1075_v0 }
 0x186   :  { %v950_v2 = vadd.f32 %v2347_v4, %v934_v25  ;;  %v1132_v14 = vmul.f32 %v1127_v45, %v1082_v59  ;;  %v1260_v36 = vsel %vm269_vm7, %v1257_v23, %v1259_v13  ;;  %v1156_v11 = vmul.f32 %v1154_v46, %v1147_v61 }
 0x187   :  { %v1002_v5 = vadd.f32 %v2383_v33, %v990_v7  ;;  %v1223_v50 = vrot.slane %v2446_v27, %v1963_v57  ;;  %v1173_v44 = vmul.f32 %v2368_v3, %v1167_v42  ;;  %v1216_v49 = vmul.f32 %v1211_v38, %v1154_v46 }
 0x188   :  { %v966_v43 = vadd.f32 %v2357_v40, %v950_v2  ;;  %v1172_v47 = vmul.f32 %v2368_v3, %v1163_v24  ;;  %v1229_v4 = vmul.f32 %v1227_v20, %v2368_v3  ;;  %v1199_v39 = vrot.slane %v1143_v15, %v1951_v6 }
 0x189   :  { %v1014_v0 = vadd.f32 %v2395_v53, %v1002_v5  ;;  %v1175_v59 = vadd.f32 %v1173_v44, %v1159_v55  ;;  %v1251_v33 = vrot.slane %v1143_v15, %v1967_v17  ;;  %v1183_v31 = vrot.slane %v1143_v15, %v1948_v63  ;;  %v1290_v55 = vpop.permute.xlu1 %1289 }
 0x18a   :  { %v1038_v32 = vadd.f32 %v2399_v18, %v966_v43  ;;  %v1231_v10 = vadd.f32 %v1229_v4, %v1219_v19  ;;  %v1239_v40 = vrot.slane %v1143_v15, %v1960_v56  ;;  %v1228_v8 = vmul.f32 %v1223_v50, %v2368_v3  ;;  %v2616_v3 = vld [vmem:[#allocation8_spill] sm:$0xff] }
 0x18b   :  { %v1098_v1 = vadd.f32 %v1096_v62, %v1014_v0  ;;  %v1195_v21 = vrot.slane %v2446_v27, %v1951_v6  ;;  %v1261_v53 = vsel %vm269_vm7, %v1259_v13, %v1257_v23  ;;  %v1247_v18 = vrot.slane %v2446_v27, %v1967_v17  ;;  %v2615_v62 = vld [vmem:[#allocation7_spill] sm:$0xff] }
 0x18c   :  { %v1054_v37 = vadd.f32 %v2409_v60, %v1038_v32  ;;  %v1189_v16 = vmul.f32 %v2406_v28, %v1183_v31  ;;  %v1241_v58 = vmul.f32 %v1239_v40, %v2406_v28  ;;  %v1205_v15 = vmul.f32 %v1202_v26, %v1199_v39 }
 0x18d   :  { %v1110_v45 = vadd.f32 %v1108_v9, %v1098_v1  ;;  %v2500_v22 = vmul.f32 %v1260_v36, %v2615_v62  ;;  %v2503_v61 = vmul.f32 %v1261_v53, %v2616_v3  ;;  %v1253_v23 = vmul.f32 %v1251_v33, %v1202_v26  ;;  %v1306_v40 = vpop.permute.xlu1 %1305 }
 0x18e   :  { %v1070_v48 = vadd.f32 %v2413_v29, %v1054_v37  ;;  %v1191_v46 = vadd.f32 %v1189_v16, %v1175_v59  ;;  %v1243_v60 = vadd.f32 %v1241_v58, %v1231_v10  ;;  %v1179_v35 = vrot.slane %v2446_v27, %v1948_v63  ;;  %v1274_v29 = vpop.permute.xlu0 %1273 }
 0x18f   :  { %v1122_v12 = vadd.f32 %v1120_v41, %v1110_v45  ;;  %v1271_v34 = vrot.slane %v2503_v61, %v1689_v51  ;;  %v1335_v9 = vrot.slane %v2503_v61, %v1839_v54  ;;  %v1235_v13 = vrot.slane %v2446_v27, %v1960_v56 }
 0x190   :  { %v1086_v42 = vadd.f32 %v1084_v30, %v1070_v48  ;;  %v1207_v25 = vadd.f32 %v1205_v15, %v1191_v46  ;;  %v1255_v38 = vadd.f32 %v1253_v23, %v1243_v60  ;;  %v1267_v20 = vrot.slane %v2500_v22, %v1689_v51 }
 0x191   :  { %v1134_v24 = vadd.f32 %v1132_v14, %v1122_v12  ;;  %v1331_v41 = vrot.slane %v2500_v22, %v1839_v54  ;;  %v1337_v7 = vmul.f32 %v1335_v9, %v1274_v29  ;;  %v1277_v2 = vmul.f32 %v1274_v29, %v1271_v34 }
 0x192   :  { %v1158_v19 = vadd.f32 %v1156_v11, %v1086_v42  ;;  %v1283_v30 = vrot.slane %v2500_v22, %v1692_v52  ;;  %v1287_v27 = vrot.slane %v2503_v61, %v1692_v52  ;;  %v1343_v14 = vrot.slane %v2500_v22, %v1963_v57  ;;  %v1322_v53 = vpop.permute.xlu0 %1321 }
 0x193   :  { %v1218_v36 = vadd.f32 %v1216_v49, %v1134_v24  ;;  %v1339_v5 = vadd.f32 %v1337_v7, %v1255_v38  ;;  %v1347_v51 = vrot.slane %v2503_v61, %v1963_v57  ;;  %v1188_v54 = vmul.f32 %v2406_v28, %v1179_v35 }
 0x194   :  { %v1174_v50 = vadd.f32 %v1172_v47, %v1158_v19  ;;  %v1279_v44 = vadd.f32 %v1277_v2, %v1207_v25  ;;  %v1204_v43 = vmul.f32 %v1202_v26, %v1195_v21  ;;  %v1252_v4 = vmul.f32 %v1247_v18, %v1202_v26 }
 0x195   :  { %v1230_v11 = vadd.f32 %v1228_v8, %v1218_v36  ;;  %v1240_v0 = vmul.f32 %v1235_v13, %v2406_v28  ;;  %v1276_v39 = vmul.f32 %v1274_v29, %v1267_v20  ;;  %v1336_v52 = vmul.f32 %v1331_v41, %v1274_v29 }
 0x196   :  { %v1190_v59 = vadd.f32 %v1188_v54, %v1174_v50  ;;  %v1293_v49 = vmul.f32 %v1290_v55, %v1287_v27  ;;  %v1292_v32 = vmul.f32 %v1290_v55, %v1283_v30  ;;  %v1348_v10 = vmul.f32 %v1343_v14, %v1290_v55 }
 0x197   :  { %v1242_v33 = vadd.f32 %v1240_v0, %v1230_v11  ;;  %v1349_v31 = vmul.f32 %v1347_v51, %v1290_v55  ;;  %v1319_v47 = vrot.slane %v2503_v61, %v1951_v6  ;;  %v1303_v8 = vrot.slane %v2503_v61, %v1948_v63 }
 0x198   :  { %v1206_v1 = vadd.f32 %v1204_v43, %v1190_v59  ;;  %v1295_v57 = vadd.f32 %v1293_v49, %v1279_v44  ;;  %v1371_v28 = vrot.slane %v2503_v61, %v1967_v17  ;;  %v1359_v37 = vrot.slane %v2503_v61, %v1960_v56 }
 0x199   :  { %v1254_v26 = vadd.f32 %v1252_v4, %v1242_v33  ;;  %v1351_v21 = vadd.f32 %v1349_v31, %v1339_v5  ;;  %v1315_v16 = vrot.slane %v2500_v22, %v1951_v6  ;;  %v1299_v58 = vrot.slane %v2500_v22, %v1948_v63  ;;  %v1380_v6 = vpop.permute.xlu1 %1379 }
 0x19a   :  { %v1278_v18 = vadd.f32 %v1276_v39, %v1206_v1  ;;  %v1309_v45 = vmul.f32 %v1306_v40, %v1303_v8  ;;  %v1367_v62 = vrot.slane %v2500_v22, %v1967_v17  ;;  %v1355_v3 = vrot.slane %v2500_v22, %v1960_v56 }
 0x19b   :  { %v1338_v15 = vadd.f32 %v1336_v52, %v1254_v26  ;;  %v1361_v48 = vmul.f32 %v1359_v37, %v1306_v40  ;;  %v1325_v46 = vmul.f32 %v1322_v53, %v1319_v47  ;;  %v1308_v60 = vmul.f32 %v1306_v40, %v1299_v58 }
 0x19c   :  { %v1294_v23 = vadd.f32 %v1292_v32, %v1278_v18  ;;  %v1311_v61 = vadd.f32 %v1309_v45, %v1295_v57  ;;  %v1373_v35 = vmul.f32 %v1371_v28, %v1322_v53  ;;  %v1360_v34 = vmul.f32 %v1355_v3, %v1306_v40 }
 0x19d   :  { %v1350_v12 = vadd.f32 %v1348_v10, %v1338_v15  ;;  %v1363_v9 = vadd.f32 %v1361_v48, %v1351_v21  ;;  %v1324_v42 = vmul.f32 %v1322_v53, %v1315_v16  ;;  %v1372_v25 = vmul.f32 %v1367_v62, %v1322_v53 }
 0x19e   :  { %v1310_v63 = vadd.f32 %v1308_v60, %v1294_v23  ;;  %v1327_v13 = vadd.f32 %v1325_v46, %v1311_v61 }
 0x19f   :  { %v1362_v38 = vadd.f32 %v1360_v34, %v1350_v12  ;;  %v1375_v29 = vadd.f32 %v1373_v35, %v1363_v9 }
 0x1a0   :  { %v1326_v17 = vadd.f32 %v1324_v42, %v1310_v63  ;;  %v1383_v24 = vadd.f32 %v1380_v6, %v1327_v13 }
 0x1a1   :  { %v1374_v20 = vadd.f32 %v1372_v25, %v1362_v38  ;;  %v1389_v56 = vadd.f32 %v1380_v6, %v1375_v29 }
 0x1a2   :  { %v1382_v22 = vadd.f32 %v1380_v6, %v1326_v17  ;;  %v1385_v41 = vmax.f32 %v1383_v24, 0.0 }
 0x1a3   :  { %v1388_v7 = vadd.f32 %v1380_v6, %v1374_v20  ;;  %v1391_v55 = vmax.f32 %v1389_v56, 0.0 }
 0x1a4   :  { %v1384_v19 = vmax.f32 %v1382_v22, 0.0  ;;  %1387 = vst [vmem:[%s2562_s6 + $0x8] sm:$0xff] %v1385_v41 }
 0x1a5   :  { %v1390_v2 = vmax.f32 %v1388_v7, 0.0  ;;  %1415 = vst [vmem:[%s2562_s6 + $0x18] sm:$0xff] %v1391_v55 }
 0x1a6   :  { %1386 = vst [vmem:[%s2562_s6] sm:$0xff] %v1384_v19 }
 0x1a7   :  { %1414 = vst [vmem:[%s2562_s6 + $0x10] sm:$0xff] %v1390_v2 }

</bundles_post_ra>
